<compile_context>
chip_gen: v7x
topology: tpu7x:2x2x1
jax: 0.10.0
libtpu: 0.0.40
codegen_flags: <defaults>
</compile_context>

<pallas_src>
import functools

import jax
import jax.numpy as jnp
from jax.experimental import pallas as pl
from jax.experimental.pallas import tpu as pltpu

# ---- model hyper-parameters (mirroring LSTM_train.py) -----------------------
d_model = 64
input_size = 6          # len(feature_columns)
output_size = 1
hidden_size = 32
num_layers = 2
proj_size = 16          # linear_in output width
dropout_p = 0.01        # inactive in eval-mode forward

# MXU operand dtype (accumulation always f32 via preferred_element_type).
MXU_DTYPE = jnp.bfloat16

_VMEM = pl.BlockSpec(memory_space=pltpu.MemorySpace.VMEM)


def _mxu_dot(a, b):
    """MXU matmul with narrowed operands and f32 accumulation."""
    return jnp.dot(a.astype(MXU_DTYPE), b.astype(MXU_DTYPE),
                   preferred_element_type=jnp.float32)


def _softsign(y):
    # y / (1 + |y|) with the divide pushed to the EUP reciprocal slot.
    return y * pl.reciprocal(1.0 + jnp.abs(y), approx=True)


# ---- fused forward kernel ----------------------------------------------------
def _fused_forward_kernel(x_ref,
                          w_in_ref, b_in_ref,
                          wih0_ref, whh0_ref, b0_ref,
                          wih1_ref, whh1_ref, b1_ref,
                          w_f2_ref, b_f2_ref,
                          w_m2_ref, b_m2_ref,
                          w_m3_ref, b_m3_ref,
                          w_out_ref, b_out_ref,
                          o_ref, *, T, B, H):
    """Full forward pass.

    x_ref: (T*B, input_size)  time-major flattened (B already sublane-padded).
    o_ref: (T*B, output_size)
    All parameters live in VMEM; gate layout is [i, f, o, g].
    """
    # linear_in
    x = _mxu_dot(x_ref[...], w_in_ref[...]) + b_in_ref[...]          # (T*B, 16)

    def lstm_layer(seq, wih, whh, b):
        # Hoisted input projection: one batched matmul for every timestep.
        gates_x = _mxu_dot(seq, wih) + b                              # (T*B, 4H)
        whh_n = whh.astype(MXU_DTYPE)                                 # cast once
        h = jnp.zeros((B, H), jnp.float32)
        c = jnp.zeros((B, H), jnp.float32)
        outs = []
        for t in range(T):                                            # unrolled (T static)
            g = gates_x[t * B:(t + 1) * B, :] + jnp.dot(
                h.astype(MXU_DTYPE), whh_n,
                preferred_element_type=jnp.float32)                   # (B, 4H)
            # [i, f, o] -> one contiguous sigmoid slab, [g] -> one tanh slab
            sig = jax.nn.sigmoid(g[:, 0:3 * H])
            i_g = sig[:, 0:H]
            f_g = sig[:, H:2 * H]
            o_g = sig[:, 2 * H:3 * H]
            g_g = jnp.tanh(g[:, 3 * H:4 * H])
            c = f_g * c + i_g * g_g
            h = o_g * jnp.tanh(c)
            outs.append(h)
        return jnp.concatenate(outs, axis=0)                          # (T*B, H)

    h_seq = lstm_layer(x, wih0_ref[...], whh0_ref[...], b0_ref[...])
    h_seq = lstm_layer(h_seq, wih1_ref[...], whh1_ref[...], b1_ref[...])

    # head MLP
    y = _softsign(_mxu_dot(h_seq, w_f2_ref[...]) + b_f2_ref[...])     # (T*B, 64)
    # TODO(synk): training-mode dropout (p=0.01) not implemented; identity in eval.
    y = _softsign(_mxu_dot(y, w_m2_ref[...]) + b_m2_ref[...])
    y = _softsign(_mxu_dot(y, w_m3_ref[...]) + b_m3_ref[...])
    y = _mxu_dot(y, w_out_ref[...]) + b_out_ref[...]                  # (T*B, 1)
    o_ref[...] = y.astype(o_ref.dtype)


# ---- parameter init (deterministic, PyTorch-style U(-1/sqrt(fan), +)) --------
def init_params(key):
    keys = iter(jax.random.split(key, 64))

    def unif(shape, fan_in):
        bound = 1.0 / jnp.sqrt(float(fan_in))
        return jax.random.uniform(next(keys), shape, jnp.float32, -bound, bound)

    p = {}
    # linear_in: 6 -> 16
    p["w_in"] = unif((input_size, proj_size), input_size)
    p["b_in"] = unif((1, proj_size), input_size)
    # LSTM layers.  Gate column layout here is [i, f, o, g]; when porting
    # PyTorch weights ([i, f, g, o]) permute the last two gate blocks.
    p["wih"], p["whh"], p["b_lstm"] = [], [], []
    for l in range(num_layers):
        in_l = proj_size if l == 0 else hidden_size
        p["wih"].append(unif((in_l, 4 * hidden_size), hidden_size))
        p["whh"].append(unif((hidden_size, 4 * hidden_size), hidden_size))
        b_ih = unif((1, 4 * hidden_size), hidden_size)
        b_hh = unif((1, 4 * hidden_size), hidden_size)
        p["b_lstm"].append(b_ih + b_hh)
    # head
    p["w_f2"] = unif((hidden_size, d_model), hidden_size)
    p["b_f2"] = unif((1, d_model), hidden_size)
    p["w_m2"] = unif((d_model, d_model), d_model)
    p["b_m2"] = unif((1, d_model), d_model)
    p["w_m3"] = unif((d_model, d_model), d_model)
    p["b_m3"] = unif((1, d_model), d_model)
    p["w_out"] = unif((d_model, output_size), d_model)
    p["b_out"] = unif((1, output_size), d_model)
    return p


# ---- forward pass ------------------------------------------------------------
def lstm_model_forward(params, src):
    # src: (B, T, input_size) float32, batch_first like nn.LSTM(batch_first=True)
    B, T, F = src.shape
    B_pad = ((B + 7) // 8) * 8                       # sublane-align the batch

    x_tm = jnp.transpose(src, (1, 0, 2))             # (T, B, F) time-major
    if B_pad != B:
        x_tm = jnp.pad(x_tm, ((0, 0), (0, B_pad - B), (0, 0)))
    x_tm = x_tm.reshape(T * B_pad, F)

    kernel = functools.partial(_fused_forward_kernel, T=T, B=B_pad, H=hidden_size)
    out = pl.pallas_call(
        kernel,
        out_shape=jax.ShapeDtypeStruct((T * B_pad, output_size), jnp.float32),
        in_specs=[_VMEM] * 17,
        out_specs=_VMEM,
    )(x_tm,
      params["w_in"], params["b_in"],
      params["wih"][0], params["whh"][0], params["b_lstm"][0],
      params["wih"][1], params["whh"][1], params["b_lstm"][1],
      params["w_f2"], params["b_f2"],
      params["w_m2"], params["b_m2"],
      params["w_m3"], params["b_m3"],
      params["w_out"], params["b_out"])

    out = out.reshape(T, B_pad, output_size)[:, :B, :]
    return jnp.transpose(out, (1, 0, 2))             # (B, T, output_size)


if __name__ == "__main__":
    key = jax.random.PRNGKey(0)
    pkey, xkey = jax.random.split(key)

    params = init_params(pkey)

    batch, seq = 2, 8
    src = jax.random.normal(xkey, (batch, seq, input_size), dtype=jnp.float32)

    out = jax.jit(lstm_model_forward)(params, src)
    out = jax.block_until_ready(out)

    assert out.shape == (batch, seq, output_size), out.shape
    assert out.dtype == jnp.float32
    assert bool(jnp.all(jnp.isfinite(out)))
    print("KERNEL_OK")
</pallas_src>

<mosaic_0001>
module attributes {stable_mosaic.version = 11 : i64} {
  func.func @_fused_forward_kernel(%arg0: memref<64x6xf32, #tpu.memory_space<vmem>>, %arg1: memref<6x16xf32, #tpu.memory_space<vmem>>, %arg2: memref<1x16xf32, #tpu.memory_space<vmem>>, %arg3: memref<16x128xf32, #tpu.memory_space<vmem>>, %arg4: memref<32x128xf32, #tpu.memory_space<vmem>>, %arg5: memref<1x128xf32, #tpu.memory_space<vmem>>, %arg6: memref<32x128xf32, #tpu.memory_space<vmem>>, %arg7: memref<32x128xf32, #tpu.memory_space<vmem>>, %arg8: memref<1x128xf32, #tpu.memory_space<vmem>>, %arg9: memref<32x64xf32, #tpu.memory_space<vmem>>, %arg10: memref<1x64xf32, #tpu.memory_space<vmem>>, %arg11: memref<64x64xf32, #tpu.memory_space<vmem>>, %arg12: memref<1x64xf32, #tpu.memory_space<vmem>>, %arg13: memref<64x64xf32, #tpu.memory_space<vmem>>, %arg14: memref<1x64xf32, #tpu.memory_space<vmem>>, %arg15: memref<64x1xf32, #tpu.memory_space<vmem>>, %arg16: memref<1x1xf32, #tpu.memory_space<vmem>>, %arg17: memref<64x1xf32, #tpu.memory_space<vmem>>) attributes {dimension_semantics = [], scalar_prefetch = 0 : i64, scratch_operands = 0 : i64, tpu.core_type = #tpu.core_type<tc>} {
    %c0 = arith.constant 0 : index
    %c0_0 = arith.constant 0 : index
    %0 = vector.load %arg0[%c0, %c0_0] : memref<64x6xf32, #tpu.memory_space<vmem>>, vector<64x6xf32>
    %c0_1 = arith.constant 0 : index
    %c0_2 = arith.constant 0 : index
    %1 = vector.load %arg1[%c0_1, %c0_2] : memref<6x16xf32, #tpu.memory_space<vmem>>, vector<6x16xf32>
    %2 = arith.truncf %0 : vector<64x6xf32> to vector<64x6xbf16>
    %3 = arith.truncf %1 : vector<6x16xf32> to vector<6x16xbf16>
    %cst = arith.constant dense<0.000000e+00> : vector<64x16xf32>
    %4 = tpu.matmul %2, %3, %cst {dimension_numbers = #tpu.dot_dimension_numbers<[1], [0], [0], [1], [0, 0, 1, 1], [], []>} : vector<64x6xbf16>, vector<6x16xbf16>, vector<64x16xf32> -> vector<64x16xf32>
    %c0_3 = arith.constant 0 : index
    %c0_4 = arith.constant 0 : index
    %5 = vector.load %arg2[%c0_3, %c0_4] : memref<1x16xf32, #tpu.memory_space<vmem>>, vector<1x16xf32>
    %6 = vector.broadcast %5 : vector<1x16xf32> to vector<64x16xf32>
    %7 = arith.addf %4, %6 : vector<64x16xf32>
    %c0_5 = arith.constant 0 : index
    %c0_6 = arith.constant 0 : index
    %8 = vector.load %arg3[%c0_5, %c0_6] : memref<16x128xf32, #tpu.memory_space<vmem>>, vector<16x128xf32>
    %c0_7 = arith.constant 0 : index
    %c0_8 = arith.constant 0 : index
    %9 = vector.load %arg4[%c0_7, %c0_8] : memref<32x128xf32, #tpu.memory_space<vmem>>, vector<32x128xf32>
    %c0_9 = arith.constant 0 : index
    %c0_10 = arith.constant 0 : index
    %10 = vector.load %arg5[%c0_9, %c0_10] : memref<1x128xf32, #tpu.memory_space<vmem>>, vector<1x128xf32>
    %11 = arith.truncf %7 : vector<64x16xf32> to vector<64x16xbf16>
    %12 = arith.truncf %8 : vector<16x128xf32> to vector<16x128xbf16>
    %cst_11 = arith.constant dense<0.000000e+00> : vector<64x128xf32>
    %13 = tpu.matmul %11, %12, %cst_11 {dimension_numbers = #tpu.dot_dimension_numbers<[1], [0], [0], [1], [0, 0, 1, 1], [], []>} : vector<64x16xbf16>, vector<16x128xbf16>, vector<64x128xf32> -> vector<64x128xf32>
    %14 = vector.broadcast %10 : vector<1x128xf32> to vector<64x128xf32>
    %15 = arith.addf %13, %14 : vector<64x128xf32>
    %16 = arith.truncf %9 : vector<32x128xf32> to vector<32x128xbf16>
    %cst_12 = arith.constant 0.000000e+00 : f32
    %17 = vector.broadcast %cst_12 : f32 to vector<8x32xf32>
    %cst_13 = arith.constant 0.000000e+00 : f32
    %18 = vector.broadcast %cst_13 : f32 to vector<8x32xf32>
    %19 = vector.extract_strided_slice %15 {offsets = [0, 0], sizes = [8, 128], strides = [1, 1]} : vector<64x128xf32> to vector<8x128xf32>
    %20 = arith.truncf %17 : vector<8x32xf32> to vector<8x32xbf16>
    %cst_14 = arith.constant dense<0.000000e+00> : vector<8x128xf32>
    %21 = tpu.matmul %20, %16, %cst_14 {dimension_numbers = #tpu.dot_dimension_numbers<[1], [0], [0], [1], [0, 0, 1, 1], [], []>} : vector<8x32xbf16>, vector<32x128xbf16>, vector<8x128xf32> -> vector<8x128xf32>
    %22 = arith.addf %19, %21 : vector<8x128xf32>
    %23 = vector.extract_strided_slice %22 {offsets = [0, 0], sizes = [8, 96], strides = [1, 1]} : vector<8x128xf32> to vector<8x96xf32>
    %24 = arith.negf %23 : vector<8x96xf32>
    %25 = math.exp %24 : vector<8x96xf32>
    %cst_15 = arith.constant 1.000000e+00 : f32
    %26 = vector.broadcast %cst_15 : f32 to vector<8x96xf32>
    %27 = arith.addf %26, %25 : vector<8x96xf32>
    %28 = arith.divf %26, %27 : vector<8x96xf32>
    %29 = vector.extract_strided_slice %28 {offsets = [0, 0], sizes = [8, 32], strides = [1, 1]} : vector<8x96xf32> to vector<8x32xf32>
    %30 = vector.extract_strided_slice %28 {offsets = [0, 32], sizes = [8, 32], strides = [1, 1]} : vector<8x96xf32> to vector<8x32xf32>
    %31 = vector.extract_strided_slice %28 {offsets = [0, 64], sizes = [8, 32], strides = [1, 1]} : vector<8x96xf32> to vector<8x32xf32>
    %32 = vector.extract_strided_slice %22 {offsets = [0, 96], sizes = [8, 32], strides = [1, 1]} : vector<8x128xf32> to vector<8x32xf32>
    %33 = math.tanh %32 : vector<8x32xf32>
    %34 = arith.mulf %30, %18 : vector<8x32xf32>
    %35 = arith.mulf %29, %33 : vector<8x32xf32>
    %36 = arith.addf %34, %35 : vector<8x32xf32>
    %37 = math.tanh %36 : vector<8x32xf32>
    %38 = arith.mulf %31, %37 : vector<8x32xf32>
    %39 = vector.extract_strided_slice %15 {offsets = [8, 0], sizes = [8, 128], strides = [1, 1]} : vector<64x128xf32> to vector<8x128xf32>
    %40 = arith.truncf %38 : vector<8x32xf32> to vector<8x32xbf16>
    %cst_16 = arith.constant dense<0.000000e+00> : vector<8x128xf32>
    %41 = tpu.matmul %40, %16, %cst_16 {dimension_numbers = #tpu.dot_dimension_numbers<[1], [0], [0], [1], [0, 0, 1, 1], [], []>} : vector<8x32xbf16>, vector<32x128xbf16>, vector<8x128xf32> -> vector<8x128xf32>
    %42 = arith.addf %39, %41 : vector<8x128xf32>
    %43 = vector.extract_strided_slice %42 {offsets = [0, 0], sizes = [8, 96], strides = [1, 1]} : vector<8x128xf32> to vector<8x96xf32>
    %44 = arith.negf %43 : vector<8x96xf32>
    %45 = math.exp %44 : vector<8x96xf32>
    %cst_17 = arith.constant 1.000000e+00 : f32
    %46 = vector.broadcast %cst_17 : f32 to vector<8x96xf32>
    %47 = arith.addf %46, %45 : vector<8x96xf32>
    %48 = arith.divf %46, %47 : vector<8x96xf32>
    %49 = vector.extract_strided_slice %48 {offsets = [0, 0], sizes = [8, 32], strides = [1, 1]} : vector<8x96xf32> to vector<8x32xf32>
    %50 = vector.extract_strided_slice %48 {offsets = [0, 32], sizes = [8, 32], strides = [1, 1]} : vector<8x96xf32> to vector<8x32xf32>
    %51 = vector.extract_strided_slice %48 {offsets = [0, 64], sizes = [8, 32], strides = [1, 1]} : vector<8x96xf32> to vector<8x32xf32>
    %52 = vector.extract_strided_slice %42 {offsets = [0, 96], sizes = [8, 32], strides = [1, 1]} : vector<8x128xf32> to vector<8x32xf32>
    %53 = math.tanh %52 : vector<8x32xf32>
    %54 = arith.mulf %50, %36 : vector<8x32xf32>
    %55 = arith.mulf %49, %53 : vector<8x32xf32>
    %56 = arith.addf %54, %55 : vector<8x32xf32>
    %57 = math.tanh %56 : vector<8x32xf32>
    %58 = arith.mulf %51, %57 : vector<8x32xf32>
    %59 = vector.extract_strided_slice %15 {offsets = [16, 0], sizes = [8, 128], strides = [1, 1]} : vector<64x128xf32> to vector<8x128xf32>
    %60 = arith.truncf %58 : vector<8x32xf32> to vector<8x32xbf16>
    %cst_18 = arith.constant dense<0.000000e+00> : vector<8x128xf32>
    %61 = tpu.matmul %60, %16, %cst_18 {dimension_numbers = #tpu.dot_dimension_numbers<[1], [0], [0], [1], [0, 0, 1, 1], [], []>} : vector<8x32xbf16>, vector<32x128xbf16>, vector<8x128xf32> -> vector<8x128xf32>
    %62 = arith.addf %59, %61 : vector<8x128xf32>
    %63 = vector.extract_strided_slice %62 {offsets = [0, 0], sizes = [8, 96], strides = [1, 1]} : vector<8x128xf32> to vector<8x96xf32>
    %64 = arith.negf %63 : vector<8x96xf32>
    %65 = math.exp %64 : vector<8x96xf32>
    %cst_19 = arith.constant 1.000000e+00 : f32
    %66 = vector.broadcast %cst_19 : f32 to vector<8x96xf32>
    %67 = arith.addf %66, %65 : vector<8x96xf32>
    %68 = arith.divf %66, %67 : vector<8x96xf32>
    %69 = vector.extract_strided_slice %68 {offsets = [0, 0], sizes = [8, 32], strides = [1, 1]} : vector<8x96xf32> to vector<8x32xf32>
    %70 = vector.extract_strided_slice %68 {offsets = [0, 32], sizes = [8, 32], strides = [1, 1]} : vector<8x96xf32> to vector<8x32xf32>
    %71 = vector.extract_strided_slice %68 {offsets = [0, 64], sizes = [8, 32], strides = [1, 1]} : vector<8x96xf32> to vector<8x32xf32>
    %72 = vector.extract_strided_slice %62 {offsets = [0, 96], sizes = [8, 32], strides = [1, 1]} : vector<8x128xf32> to vector<8x32xf32>
    %73 = math.tanh %72 : vector<8x32xf32>
    %74 = arith.mulf %70, %56 : vector<8x32xf32>
    %75 = arith.mulf %69, %73 : vector<8x32xf32>
    %76 = arith.addf %74, %75 : vector<8x32xf32>
    %77 = math.tanh %76 : vector<8x32xf32>
    %78 = arith.mulf %71, %77 : vector<8x32xf32>
    %79 = vector.extract_strided_slice %15 {offsets = [24, 0], sizes = [8, 128], strides = [1, 1]} : vector<64x128xf32> to vector<8x128xf32>
    %80 = arith.truncf %78 : vector<8x32xf32> to vector<8x32xbf16>
    %cst_20 = arith.constant dense<0.000000e+00> : vector<8x128xf32>
    %81 = tpu.matmul %80, %16, %cst_20 {dimension_numbers = #tpu.dot_dimension_numbers<[1], [0], [0], [1], [0, 0, 1, 1], [], []>} : vector<8x32xbf16>, vector<32x128xbf16>, vector<8x128xf32> -> vector<8x128xf32>
    %82 = arith.addf %79, %81 : vector<8x128xf32>
    %83 = vector.extract_strided_slice %82 {offsets = [0, 0], sizes = [8, 96], strides = [1, 1]} : vector<8x128xf32> to vector<8x96xf32>
    %84 = arith.negf %83 : vector<8x96xf32>
    %85 = math.exp %84 : vector<8x96xf32>
    %cst_21 = arith.constant 1.000000e+00 : f32
    %86 = vector.broadcast %cst_21 : f32 to vector<8x96xf32>
    %87 = arith.addf %86, %85 : vector<8x96xf32>
    %88 = arith.divf %86, %87 : vector<8x96xf32>
    %89 = vector.extract_strided_slice %88 {offsets = [0, 0], sizes = [8, 32], strides = [1, 1]} : vector<8x96xf32> to vector<8x32xf32>
    %90 = vector.extract_strided_slice %88 {offsets = [0, 32], sizes = [8, 32], strides = [1, 1]} : vector<8x96xf32> to vector<8x32xf32>
    %91 = vector.extract_strided_slice %88 {offsets = [0, 64], sizes = [8, 32], strides = [1, 1]} : vector<8x96xf32> to vector<8x32xf32>
    %92 = vector.extract_strided_slice %82 {offsets = [0, 96], sizes = [8, 32], strides = [1, 1]} : vector<8x128xf32> to vector<8x32xf32>
    %93 = math.tanh %92 : vector<8x32xf32>
    %94 = arith.mulf %90, %76 : vector<8x32xf32>
    %95 = arith.mulf %89, %93 : vector<8x32xf32>
    %96 = arith.addf %94, %95 : vector<8x32xf32>
    %97 = math.tanh %96 : vector<8x32xf32>
    %98 = arith.mulf %91, %97 : vector<8x32xf32>
    %99 = vector.extract_strided_slice %15 {offsets = [32, 0], sizes = [8, 128], strides = [1, 1]} : vector<64x128xf32> to vector<8x128xf32>
    %100 = arith.truncf %98 : vector<8x32xf32> to vector<8x32xbf16>
    %cst_22 = arith.constant dense<0.000000e+00> : vector<8x128xf32>
    %101 = tpu.matmul %100, %16, %cst_22 {dimension_numbers = #tpu.dot_dimension_numbers<[1], [0], [0], [1], [0, 0, 1, 1], [], []>} : vector<8x32xbf16>, vector<32x128xbf16>, vector<8x128xf32> -> vector<8x128xf32>
    %102 = arith.addf %99, %101 : vector<8x128xf32>
    %103 = vector.extract_strided_slice %102 {offsets = [0, 0], sizes = [8, 96], strides = [1, 1]} : vector<8x128xf32> to vector<8x96xf32>
    %104 = arith.negf %103 : vector<8x96xf32>
    %105 = math.exp %104 : vector<8x96xf32>
    %cst_23 = arith.constant 1.000000e+00 : f32
    %106 = vector.broadcast %cst_23 : f32 to vector<8x96xf32>
    %107 = arith.addf %106, %105 : vector<8x96xf32>
    %108 = arith.divf %106, %107 : vector<8x96xf32>
    %109 = vector.extract_strided_slice %108 {offsets = [0, 0], sizes = [8, 32], strides = [1, 1]} : vector<8x96xf32> to vector<8x32xf32>
    %110 = vector.extract_strided_slice %108 {offsets = [0, 32], sizes = [8, 32], strides = [1, 1]} : vector<8x96xf32> to vector<8x32xf32>
    %111 = vector.extract_strided_slice %108 {offsets = [0, 64], sizes = [8, 32], strides = [1, 1]} : vector<8x96xf32> to vector<8x32xf32>
    %112 = vector.extract_strided_slice %102 {offsets = [0, 96], sizes = [8, 32], strides = [1, 1]} : vector<8x128xf32> to vector<8x32xf32>
    %113 = math.tanh %112 : vector<8x32xf32>
    %114 = arith.mulf %110, %96 : vector<8x32xf32>
    %115 = arith.mulf %109, %113 : vector<8x32xf32>
    %116 = arith.addf %114, %115 : vector<8x32xf32>
    %117 = math.tanh %116 : vector<8x32xf32>
    %118 = arith.mulf %111, %117 : vector<8x32xf32>
    %119 = vector.extract_strided_slice %15 {offsets = [40, 0], sizes = [8, 128], strides = [1, 1]} : vector<64x128xf32> to vector<8x128xf32>
    %120 = arith.truncf %118 : vector<8x32xf32> to vector<8x32xbf16>
    %cst_24 = arith.constant dense<0.000000e+00> : vector<8x128xf32>
    %121 = tpu.matmul %120, %16, %cst_24 {dimension_numbers = #tpu.dot_dimension_numbers<[1], [0], [0], [1], [0, 0, 1, 1], [], []>} : vector<8x32xbf16>, vector<32x128xbf16>, vector<8x128xf32> -> vector<8x128xf32>
    %122 = arith.addf %119, %121 : vector<8x128xf32>
    %123 = vector.extract_strided_slice %122 {offsets = [0, 0], sizes = [8, 96], strides = [1, 1]} : vector<8x128xf32> to vector<8x96xf32>
    %124 = arith.negf %123 : vector<8x96xf32>
    %125 = math.exp %124 : vector<8x96xf32>
    %cst_25 = arith.constant 1.000000e+00 : f32
    %126 = vector.broadcast %cst_25 : f32 to vector<8x96xf32>
    %127 = arith.addf %126, %125 : vector<8x96xf32>
    %128 = arith.divf %126, %127 : vector<8x96xf32>
    %129 = vector.extract_strided_slice %128 {offsets = [0, 0], sizes = [8, 32], strides = [1, 1]} : vector<8x96xf32> to vector<8x32xf32>
    %130 = vector.extract_strided_slice %128 {offsets = [0, 32], sizes = [8, 32], strides = [1, 1]} : vector<8x96xf32> to vector<8x32xf32>
    %131 = vector.extract_strided_slice %128 {offsets = [0, 64], sizes = [8, 32], strides = [1, 1]} : vector<8x96xf32> to vector<8x32xf32>
    %132 = vector.extract_strided_slice %122 {offsets = [0, 96], sizes = [8, 32], strides = [1, 1]} : vector<8x128xf32> to vector<8x32xf32>
    %133 = math.tanh %132 : vector<8x32xf32>
    %134 = arith.mulf %130, %116 : vector<8x32xf32>
    %135 = arith.mulf %129, %133 : vector<8x32xf32>
    %136 = arith.addf %134, %135 : vector<8x32xf32>
    %137 = math.tanh %136 : vector<8x32xf32>
    %138 = arith.mulf %131, %137 : vector<8x32xf32>
    %139 = vector.extract_strided_slice %15 {offsets = [48, 0], sizes = [8, 128], strides = [1, 1]} : vector<64x128xf32> to vector<8x128xf32>
    %140 = arith.truncf %138 : vector<8x32xf32> to vector<8x32xbf16>
    %cst_26 = arith.constant dense<0.000000e+00> : vector<8x128xf32>
    %141 = tpu.matmul %140, %16, %cst_26 {dimension_numbers = #tpu.dot_dimension_numbers<[1], [0], [0], [1], [0, 0, 1, 1], [], []>} : vector<8x32xbf16>, vector<32x128xbf16>, vector<8x128xf32> -> vector<8x128xf32>
    %142 = arith.addf %139, %141 : vector<8x128xf32>
    %143 = vector.extract_strided_slice %142 {offsets = [0, 0], sizes = [8, 96], strides = [1, 1]} : vector<8x128xf32> to vector<8x96xf32>
    %144 = arith.negf %143 : vector<8x96xf32>
    %145 = math.exp %144 : vector<8x96xf32>
    %cst_27 = arith.constant 1.000000e+00 : f32
    %146 = vector.broadcast %cst_27 : f32 to vector<8x96xf32>
    %147 = arith.addf %146, %145 : vector<8x96xf32>
    %148 = arith.divf %146, %147 : vector<8x96xf32>
    %149 = vector.extract_strided_slice %148 {offsets = [0, 0], sizes = [8, 32], strides = [1, 1]} : vector<8x96xf32> to vector<8x32xf32>
    %150 = vector.extract_strided_slice %148 {offsets = [0, 32], sizes = [8, 32], strides = [1, 1]} : vector<8x96xf32> to vector<8x32xf32>
    %151 = vector.extract_strided_slice %148 {offsets = [0, 64], sizes = [8, 32], strides = [1, 1]} : vector<8x96xf32> to vector<8x32xf32>
    %152 = vector.extract_strided_slice %142 {offsets = [0, 96], sizes = [8, 32], strides = [1, 1]} : vector<8x128xf32> to vector<8x32xf32>
    %153 = math.tanh %152 : vector<8x32xf32>
    %154 = arith.mulf %150, %136 : vector<8x32xf32>
    %155 = arith.mulf %149, %153 : vector<8x32xf32>
    %156 = arith.addf %154, %155 : vector<8x32xf32>
    %157 = math.tanh %156 : vector<8x32xf32>
    %158 = arith.mulf %151, %157 : vector<8x32xf32>
    %159 = vector.extract_strided_slice %15 {offsets = [56, 0], sizes = [8, 128], strides = [1, 1]} : vector<64x128xf32> to vector<8x128xf32>
    %160 = arith.truncf %158 : vector<8x32xf32> to vector<8x32xbf16>
    %cst_28 = arith.constant dense<0.000000e+00> : vector<8x128xf32>
    %161 = tpu.matmul %160, %16, %cst_28 {dimension_numbers = #tpu.dot_dimension_numbers<[1], [0], [0], [1], [0, 0, 1, 1], [], []>} : vector<8x32xbf16>, vector<32x128xbf16>, vector<8x128xf32> -> vector<8x128xf32>
    %162 = arith.addf %159, %161 : vector<8x128xf32>
    %163 = vector.extract_strided_slice %162 {offsets = [0, 0], sizes = [8, 96], strides = [1, 1]} : vector<8x128xf32> to vector<8x96xf32>
    %164 = arith.negf %163 : vector<8x96xf32>
    %165 = math.exp %164 : vector<8x96xf32>
    %cst_29 = arith.constant 1.000000e+00 : f32
    %166 = vector.broadcast %cst_29 : f32 to vector<8x96xf32>
    %167 = arith.addf %166, %165 : vector<8x96xf32>
    %168 = arith.divf %166, %167 : vector<8x96xf32>
    %169 = vector.extract_strided_slice %168 {offsets = [0, 0], sizes = [8, 32], strides = [1, 1]} : vector<8x96xf32> to vector<8x32xf32>
    %170 = vector.extract_strided_slice %168 {offsets = [0, 32], sizes = [8, 32], strides = [1, 1]} : vector<8x96xf32> to vector<8x32xf32>
    %171 = vector.extract_strided_slice %168 {offsets = [0, 64], sizes = [8, 32], strides = [1, 1]} : vector<8x96xf32> to vector<8x32xf32>
    %172 = vector.extract_strided_slice %162 {offsets = [0, 96], sizes = [8, 32], strides = [1, 1]} : vector<8x128xf32> to vector<8x32xf32>
    %173 = math.tanh %172 : vector<8x32xf32>
    %174 = arith.mulf %170, %156 : vector<8x32xf32>
    %175 = arith.mulf %169, %173 : vector<8x32xf32>
    %176 = arith.addf %174, %175 : vector<8x32xf32>
    %177 = math.tanh %176 : vector<8x32xf32>
    %178 = arith.mulf %171, %177 : vector<8x32xf32>
    %179 = tpu.concatenate %38, %58, %78, %98, %118, %138, %158, %178 in 0 : vector<8x32xf32>, vector<8x32xf32>, vector<8x32xf32>, vector<8x32xf32>, vector<8x32xf32>, vector<8x32xf32>, vector<8x32xf32>, vector<8x32xf32> -> vector<64x32xf32>
    %c0_30 = arith.constant 0 : index
    %c0_31 = arith.constant 0 : index
    %180 = vector.load %arg6[%c0_30, %c0_31] : memref<32x128xf32, #tpu.memory_space<vmem>>, vector<32x128xf32>
    %c0_32 = arith.constant 0 : index
    %c0_33 = arith.constant 0 : index
    %181 = vector.load %arg7[%c0_32, %c0_33] : memref<32x128xf32, #tpu.memory_space<vmem>>, vector<32x128xf32>
    %c0_34 = arith.constant 0 : index
    %c0_35 = arith.constant 0 : index
    %182 = vector.load %arg8[%c0_34, %c0_35] : memref<1x128xf32, #tpu.memory_space<vmem>>, vector<1x128xf32>
    %183 = arith.truncf %179 : vector<64x32xf32> to vector<64x32xbf16>
    %184 = arith.truncf %180 : vector<32x128xf32> to vector<32x128xbf16>
    %cst_36 = arith.constant dense<0.000000e+00> : vector<64x128xf32>
    %185 = tpu.matmul %183, %184, %cst_36 {dimension_numbers = #tpu.dot_dimension_numbers<[1], [0], [0], [1], [0, 0, 1, 1], [], []>} : vector<64x32xbf16>, vector<32x128xbf16>, vector<64x128xf32> -> vector<64x128xf32>
    %186 = vector.broadcast %182 : vector<1x128xf32> to vector<64x128xf32>
    %187 = arith.addf %185, %186 : vector<64x128xf32>
    %188 = arith.truncf %181 : vector<32x128xf32> to vector<32x128xbf16>
    %cst_37 = arith.constant 0.000000e+00 : f32
    %189 = vector.broadcast %cst_37 : f32 to vector<8x32xf32>
    %cst_38 = arith.constant 0.000000e+00 : f32
    %190 = vector.broadcast %cst_38 : f32 to vector<8x32xf32>
    %191 = vector.extract_strided_slice %187 {offsets = [0, 0], sizes = [8, 128], strides = [1, 1]} : vector<64x128xf32> to vector<8x128xf32>
    %192 = arith.truncf %189 : vector<8x32xf32> to vector<8x32xbf16>
    %cst_39 = arith.constant dense<0.000000e+00> : vector<8x128xf32>
    %193 = tpu.matmul %192, %188, %cst_39 {dimension_numbers = #tpu.dot_dimension_numbers<[1], [0], [0], [1], [0, 0, 1, 1], [], []>} : vector<8x32xbf16>, vector<32x128xbf16>, vector<8x128xf32> -> vector<8x128xf32>
    %194 = arith.addf %191, %193 : vector<8x128xf32>
    %195 = vector.extract_strided_slice %194 {offsets = [0, 0], sizes = [8, 96], strides = [1, 1]} : vector<8x128xf32> to vector<8x96xf32>
    %196 = arith.negf %195 : vector<8x96xf32>
    %197 = math.exp %196 : vector<8x96xf32>
    %cst_40 = arith.constant 1.000000e+00 : f32
    %198 = vector.broadcast %cst_40 : f32 to vector<8x96xf32>
    %199 = arith.addf %198, %197 : vector<8x96xf32>
    %200 = arith.divf %198, %199 : vector<8x96xf32>
    %201 = vector.extract_strided_slice %200 {offsets = [0, 0], sizes = [8, 32], strides = [1, 1]} : vector<8x96xf32> to vector<8x32xf32>
    %202 = vector.extract_strided_slice %200 {offsets = [0, 32], sizes = [8, 32], strides = [1, 1]} : vector<8x96xf32> to vector<8x32xf32>
    %203 = vector.extract_strided_slice %200 {offsets = [0, 64], sizes = [8, 32], strides = [1, 1]} : vector<8x96xf32> to vector<8x32xf32>
    %204 = vector.extract_strided_slice %194 {offsets = [0, 96], sizes = [8, 32], strides = [1, 1]} : vector<8x128xf32> to vector<8x32xf32>
    %205 = math.tanh %204 : vector<8x32xf32>
    %206 = arith.mulf %202, %190 : vector<8x32xf32>
    %207 = arith.mulf %201, %205 : vector<8x32xf32>
    %208 = arith.addf %206, %207 : vector<8x32xf32>
    %209 = math.tanh %208 : vector<8x32xf32>
    %210 = arith.mulf %203, %209 : vector<8x32xf32>
    %211 = vector.extract_strided_slice %187 {offsets = [8, 0], sizes = [8, 128], strides = [1, 1]} : vector<64x128xf32> to vector<8x128xf32>
    %212 = arith.truncf %210 : vector<8x32xf32> to vector<8x32xbf16>
    %cst_41 = arith.constant dense<0.000000e+00> : vector<8x128xf32>
    %213 = tpu.matmul %212, %188, %cst_41 {dimension_numbers = #tpu.dot_dimension_numbers<[1], [0], [0], [1], [0, 0, 1, 1], [], []>} : vector<8x32xbf16>, vector<32x128xbf16>, vector<8x128xf32> -> vector<8x128xf32>
    %214 = arith.addf %211, %213 : vector<8x128xf32>
    %215 = vector.extract_strided_slice %214 {offsets = [0, 0], sizes = [8, 96], strides = [1, 1]} : vector<8x128xf32> to vector<8x96xf32>
    %216 = arith.negf %215 : vector<8x96xf32>
    %217 = math.exp %216 : vector<8x96xf32>
    %cst_42 = arith.constant 1.000000e+00 : f32
    %218 = vector.broadcast %cst_42 : f32 to vector<8x96xf32>
    %219 = arith.addf %218, %217 : vector<8x96xf32>
    %220 = arith.divf %218, %219 : vector<8x96xf32>
    %221 = vector.extract_strided_slice %220 {offsets = [0, 0], sizes = [8, 32], strides = [1, 1]} : vector<8x96xf32> to vector<8x32xf32>
    %222 = vector.extract_strided_slice %220 {offsets = [0, 32], sizes = [8, 32], strides = [1, 1]} : vector<8x96xf32> to vector<8x32xf32>
    %223 = vector.extract_strided_slice %220 {offsets = [0, 64], sizes = [8, 32], strides = [1, 1]} : vector<8x96xf32> to vector<8x32xf32>
    %224 = vector.extract_strided_slice %214 {offsets = [0, 96], sizes = [8, 32], strides = [1, 1]} : vector<8x128xf32> to vector<8x32xf32>
    %225 = math.tanh %224 : vector<8x32xf32>
    %226 = arith.mulf %222, %208 : vector<8x32xf32>
    %227 = arith.mulf %221, %225 : vector<8x32xf32>
    %228 = arith.addf %226, %227 : vector<8x32xf32>
    %229 = math.tanh %228 : vector<8x32xf32>
    %230 = arith.mulf %223, %229 : vector<8x32xf32>
    %231 = vector.extract_strided_slice %187 {offsets = [16, 0], sizes = [8, 128], strides = [1, 1]} : vector<64x128xf32> to vector<8x128xf32>
    %232 = arith.truncf %230 : vector<8x32xf32> to vector<8x32xbf16>
    %cst_43 = arith.constant dense<0.000000e+00> : vector<8x128xf32>
    %233 = tpu.matmul %232, %188, %cst_43 {dimension_numbers = #tpu.dot_dimension_numbers<[1], [0], [0], [1], [0, 0, 1, 1], [], []>} : vector<8x32xbf16>, vector<32x128xbf16>, vector<8x128xf32> -> vector<8x128xf32>
    %234 = arith.addf %231, %233 : vector<8x128xf32>
    %235 = vector.extract_strided_slice %234 {offsets = [0, 0], sizes = [8, 96], strides = [1, 1]} : vector<8x128xf32> to vector<8x96xf32>
    %236 = arith.negf %235 : vector<8x96xf32>
    %237 = math.exp %236 : vector<8x96xf32>
    %cst_44 = arith.constant 1.000000e+00 : f32
    %238 = vector.broadcast %cst_44 : f32 to vector<8x96xf32>
    %239 = arith.addf %238, %237 : vector<8x96xf32>
    %240 = arith.divf %238, %239 : vector<8x96xf32>
    %241 = vector.extract_strided_slice %240 {offsets = [0, 0], sizes = [8, 32], strides = [1, 1]} : vector<8x96xf32> to vector<8x32xf32>
    %242 = vector.extract_strided_slice %240 {offsets = [0, 32], sizes = [8, 32], strides = [1, 1]} : vector<8x96xf32> to vector<8x32xf32>
    %243 = vector.extract_strided_slice %240 {offsets = [0, 64], sizes = [8, 32], strides = [1, 1]} : vector<8x96xf32> to vector<8x32xf32>
    %244 = vector.extract_strided_slice %234 {offsets = [0, 96], sizes = [8, 32], strides = [1, 1]} : vector<8x128xf32> to vector<8x32xf32>
    %245 = math.tanh %244 : vector<8x32xf32>
    %246 = arith.mulf %242, %228 : vector<8x32xf32>
    %247 = arith.mulf %241, %245 : vector<8x32xf32>
    %248 = arith.addf %246, %247 : vector<8x32xf32>
    %249 = math.tanh %248 : vector<8x32xf32>
    %250 = arith.mulf %243, %249 : vector<8x32xf32>
    %251 = vector.extract_strided_slice %187 {offsets = [24, 0], sizes = [8, 128], strides = [1, 1]} : vector<64x128xf32> to vector<8x128xf32>
    %252 = arith.truncf %250 : vector<8x32xf32> to vector<8x32xbf16>
    %cst_45 = arith.constant dense<0.000000e+00> : vector<8x128xf32>
    %253 = tpu.matmul %252, %188, %cst_45 {dimension_numbers = #tpu.dot_dimension_numbers<[1], [0], [0], [1], [0, 0, 1, 1], [], []>} : vector<8x32xbf16>, vector<32x128xbf16>, vector<8x128xf32> -> vector<8x128xf32>
    %254 = arith.addf %251, %253 : vector<8x128xf32>
    %255 = vector.extract_strided_slice %254 {offsets = [0, 0], sizes = [8, 96], strides = [1, 1]} : vector<8x128xf32> to vector<8x96xf32>
    %256 = arith.negf %255 : vector<8x96xf32>
    %257 = math.exp %256 : vector<8x96xf32>
    %cst_46 = arith.constant 1.000000e+00 : f32
    %258 = vector.broadcast %cst_46 : f32 to vector<8x96xf32>
    %259 = arith.addf %258, %257 : vector<8x96xf32>
    %260 = arith.divf %258, %259 : vector<8x96xf32>
    %261 = vector.extract_strided_slice %260 {offsets = [0, 0], sizes = [8, 32], strides = [1, 1]} : vector<8x96xf32> to vector<8x32xf32>
    %262 = vector.extract_strided_slice %260 {offsets = [0, 32], sizes = [8, 32], strides = [1, 1]} : vector<8x96xf32> to vector<8x32xf32>
    %263 = vector.extract_strided_slice %260 {offsets = [0, 64], sizes = [8, 32], strides = [1, 1]} : vector<8x96xf32> to vector<8x32xf32>
    %264 = vector.extract_strided_slice %254 {offsets = [0, 96], sizes = [8, 32], strides = [1, 1]} : vector<8x128xf32> to vector<8x32xf32>
    %265 = math.tanh %264 : vector<8x32xf32>
    %266 = arith.mulf %262, %248 : vector<8x32xf32>
    %267 = arith.mulf %261, %265 : vector<8x32xf32>
    %268 = arith.addf %266, %267 : vector<8x32xf32>
    %269 = math.tanh %268 : vector<8x32xf32>
    %270 = arith.mulf %263, %269 : vector<8x32xf32>
    %271 = vector.extract_strided_slice %187 {offsets = [32, 0], sizes = [8, 128], strides = [1, 1]} : vector<64x128xf32> to vector<8x128xf32>
    %272 = arith.truncf %270 : vector<8x32xf32> to vector<8x32xbf16>
    %cst_47 = arith.constant dense<0.000000e+00> : vector<8x128xf32>
    %273 = tpu.matmul %272, %188, %cst_47 {dimension_numbers = #tpu.dot_dimension_numbers<[1], [0], [0], [1], [0, 0, 1, 1], [], []>} : vector<8x32xbf16>, vector<32x128xbf16>, vector<8x128xf32> -> vector<8x128xf32>
    %274 = arith.addf %271, %273 : vector<8x128xf32>
    %275 = vector.extract_strided_slice %274 {offsets = [0, 0], sizes = [8, 96], strides = [1, 1]} : vector<8x128xf32> to vector<8x96xf32>
    %276 = arith.negf %275 : vector<8x96xf32>
    %277 = math.exp %276 : vector<8x96xf32>
    %cst_48 = arith.constant 1.000000e+00 : f32
    %278 = vector.broadcast %cst_48 : f32 to vector<8x96xf32>
    %279 = arith.addf %278, %277 : vector<8x96xf32>
    %280 = arith.divf %278, %279 : vector<8x96xf32>
    %281 = vector.extract_strided_slice %280 {offsets = [0, 0], sizes = [8, 32], strides = [1, 1]} : vector<8x96xf32> to vector<8x32xf32>
    %282 = vector.extract_strided_slice %280 {offsets = [0, 32], sizes = [8, 32], strides = [1, 1]} : vector<8x96xf32> to vector<8x32xf32>
    %283 = vector.extract_strided_slice %280 {offsets = [0, 64], sizes = [8, 32], strides = [1, 1]} : vector<8x96xf32> to vector<8x32xf32>
    %284 = vector.extract_strided_slice %274 {offsets = [0, 96], sizes = [8, 32], strides = [1, 1]} : vector<8x128xf32> to vector<8x32xf32>
    %285 = math.tanh %284 : vector<8x32xf32>
    %286 = arith.mulf %282, %268 : vector<8x32xf32>
    %287 = arith.mulf %281, %285 : vector<8x32xf32>
    %288 = arith.addf %286, %287 : vector<8x32xf32>
    %289 = math.tanh %288 : vector<8x32xf32>
    %290 = arith.mulf %283, %289 : vector<8x32xf32>
    %291 = vector.extract_strided_slice %187 {offsets = [40, 0], sizes = [8, 128], strides = [1, 1]} : vector<64x128xf32> to vector<8x128xf32>
    %292 = arith.truncf %290 : vector<8x32xf32> to vector<8x32xbf16>
    %cst_49 = arith.constant dense<0.000000e+00> : vector<8x128xf32>
    %293 = tpu.matmul %292, %188, %cst_49 {dimension_numbers = #tpu.dot_dimension_numbers<[1], [0], [0], [1], [0, 0, 1, 1], [], []>} : vector<8x32xbf16>, vector<32x128xbf16>, vector<8x128xf32> -> vector<8x128xf32>
    %294 = arith.addf %291, %293 : vector<8x128xf32>
    %295 = vector.extract_strided_slice %294 {offsets = [0, 0], sizes = [8, 96], strides = [1, 1]} : vector<8x128xf32> to vector<8x96xf32>
    %296 = arith.negf %295 : vector<8x96xf32>
    %297 = math.exp %296 : vector<8x96xf32>
    %cst_50 = arith.constant 1.000000e+00 : f32
    %298 = vector.broadcast %cst_50 : f32 to vector<8x96xf32>
    %299 = arith.addf %298, %297 : vector<8x96xf32>
    %300 = arith.divf %298, %299 : vector<8x96xf32>
    %301 = vector.extract_strided_slice %300 {offsets = [0, 0], sizes = [8, 32], strides = [1, 1]} : vector<8x96xf32> to vector<8x32xf32>
    %302 = vector.extract_strided_slice %300 {offsets = [0, 32], sizes = [8, 32], strides = [1, 1]} : vector<8x96xf32> to vector<8x32xf32>
    %303 = vector.extract_strided_slice %300 {offsets = [0, 64], sizes = [8, 32], strides = [1, 1]} : vector<8x96xf32> to vector<8x32xf32>
    %304 = vector.extract_strided_slice %294 {offsets = [0, 96], sizes = [8, 32], strides = [1, 1]} : vector<8x128xf32> to vector<8x32xf32>
    %305 = math.tanh %304 : vector<8x32xf32>
    %306 = arith.mulf %302, %288 : vector<8x32xf32>
    %307 = arith.mulf %301, %305 : vector<8x32xf32>
    %308 = arith.addf %306, %307 : vector<8x32xf32>
    %309 = math.tanh %308 : vector<8x32xf32>
    %310 = arith.mulf %303, %309 : vector<8x32xf32>
    %311 = vector.extract_strided_slice %187 {offsets = [48, 0], sizes = [8, 128], strides = [1, 1]} : vector<64x128xf32> to vector<8x128xf32>
    %312 = arith.truncf %310 : vector<8x32xf32> to vector<8x32xbf16>
    %cst_51 = arith.constant dense<0.000000e+00> : vector<8x128xf32>
    %313 = tpu.matmul %312, %188, %cst_51 {dimension_numbers = #tpu.dot_dimension_numbers<[1], [0], [0], [1], [0, 0, 1, 1], [], []>} : vector<8x32xbf16>, vector<32x128xbf16>, vector<8x128xf32> -> vector<8x128xf32>
    %314 = arith.addf %311, %313 : vector<8x128xf32>
    %315 = vector.extract_strided_slice %314 {offsets = [0, 0], sizes = [8, 96], strides = [1, 1]} : vector<8x128xf32> to vector<8x96xf32>
    %316 = arith.negf %315 : vector<8x96xf32>
    %317 = math.exp %316 : vector<8x96xf32>
    %cst_52 = arith.constant 1.000000e+00 : f32
    %318 = vector.broadcast %cst_52 : f32 to vector<8x96xf32>
    %319 = arith.addf %318, %317 : vector<8x96xf32>
    %320 = arith.divf %318, %319 : vector<8x96xf32>
    %321 = vector.extract_strided_slice %320 {offsets = [0, 0], sizes = [8, 32], strides = [1, 1]} : vector<8x96xf32> to vector<8x32xf32>
    %322 = vector.extract_strided_slice %320 {offsets = [0, 32], sizes = [8, 32], strides = [1, 1]} : vector<8x96xf32> to vector<8x32xf32>
    %323 = vector.extract_strided_slice %320 {offsets = [0, 64], sizes = [8, 32], strides = [1, 1]} : vector<8x96xf32> to vector<8x32xf32>
    %324 = vector.extract_strided_slice %314 {offsets = [0, 96], sizes = [8, 32], strides = [1, 1]} : vector<8x128xf32> to vector<8x32xf32>
    %325 = math.tanh %324 : vector<8x32xf32>
    %326 = arith.mulf %322, %308 : vector<8x32xf32>
    %327 = arith.mulf %321, %325 : vector<8x32xf32>
    %328 = arith.addf %326, %327 : vector<8x32xf32>
    %329 = math.tanh %328 : vector<8x32xf32>
    %330 = arith.mulf %323, %329 : vector<8x32xf32>
    %331 = vector.extract_strided_slice %187 {offsets = [56, 0], sizes = [8, 128], strides = [1, 1]} : vector<64x128xf32> to vector<8x128xf32>
    %332 = arith.truncf %330 : vector<8x32xf32> to vector<8x32xbf16>
    %cst_53 = arith.constant dense<0.000000e+00> : vector<8x128xf32>
    %333 = tpu.matmul %332, %188, %cst_53 {dimension_numbers = #tpu.dot_dimension_numbers<[1], [0], [0], [1], [0, 0, 1, 1], [], []>} : vector<8x32xbf16>, vector<32x128xbf16>, vector<8x128xf32> -> vector<8x128xf32>
    %334 = arith.addf %331, %333 : vector<8x128xf32>
    %335 = vector.extract_strided_slice %334 {offsets = [0, 0], sizes = [8, 96], strides = [1, 1]} : vector<8x128xf32> to vector<8x96xf32>
    %336 = arith.negf %335 : vector<8x96xf32>
    %337 = math.exp %336 : vector<8x96xf32>
    %cst_54 = arith.constant 1.000000e+00 : f32
    %338 = vector.broadcast %cst_54 : f32 to vector<8x96xf32>
    %339 = arith.addf %338, %337 : vector<8x96xf32>
    %340 = arith.divf %338, %339 : vector<8x96xf32>
    %341 = vector.extract_strided_slice %340 {offsets = [0, 0], sizes = [8, 32], strides = [1, 1]} : vector<8x96xf32> to vector<8x32xf32>
    %342 = vector.extract_strided_slice %340 {offsets = [0, 32], sizes = [8, 32], strides = [1, 1]} : vector<8x96xf32> to vector<8x32xf32>
    %343 = vector.extract_strided_slice %340 {offsets = [0, 64], sizes = [8, 32], strides = [1, 1]} : vector<8x96xf32> to vector<8x32xf32>
    %344 = vector.extract_strided_slice %334 {offsets = [0, 96], sizes = [8, 32], strides = [1, 1]} : vector<8x128xf32> to vector<8x32xf32>
    %345 = math.tanh %344 : vector<8x32xf32>
    %346 = arith.mulf %342, %328 : vector<8x32xf32>
    %347 = arith.mulf %341, %345 : vector<8x32xf32>
    %348 = arith.addf %346, %347 : vector<8x32xf32>
    %349 = math.tanh %348 : vector<8x32xf32>
    %350 = arith.mulf %343, %349 : vector<8x32xf32>
    %351 = tpu.concatenate %210, %230, %250, %270, %290, %310, %330, %350 in 0 : vector<8x32xf32>, vector<8x32xf32>, vector<8x32xf32>, vector<8x32xf32>, vector<8x32xf32>, vector<8x32xf32>, vector<8x32xf32>, vector<8x32xf32> -> vector<64x32xf32>
    %c0_55 = arith.constant 0 : index
    %c0_56 = arith.constant 0 : index
    %352 = vector.load %arg9[%c0_55, %c0_56] : memref<32x64xf32, #tpu.memory_space<vmem>>, vector<32x64xf32>
    %353 = arith.truncf %351 : vector<64x32xf32> to vector<64x32xbf16>
    %354 = arith.truncf %352 : vector<32x64xf32> to vector<32x64xbf16>
    %cst_57 = arith.constant dense<0.000000e+00> : vector<64x64xf32>
    %355 = tpu.matmul %353, %354, %cst_57 {dimension_numbers = #tpu.dot_dimension_numbers<[1], [0], [0], [1], [0, 0, 1, 1], [], []>} : vector<64x32xbf16>, vector<32x64xbf16>, vector<64x64xf32> -> vector<64x64xf32>
    %c0_58 = arith.constant 0 : index
    %c0_59 = arith.constant 0 : index
    %356 = vector.load %arg10[%c0_58, %c0_59] : memref<1x64xf32, #tpu.memory_space<vmem>>, vector<1x64xf32>
    %357 = vector.broadcast %356 : vector<1x64xf32> to vector<64x64xf32>
    %358 = arith.addf %355, %357 : vector<64x64xf32>
    %359 = math.absf %358 : vector<64x64xf32>
    %cst_60 = arith.constant 1.000000e+00 : f32
    %360 = vector.broadcast %cst_60 : f32 to vector<64x64xf32>
    %361 = arith.addf %360, %359 : vector<64x64xf32>
    %362 = tpu.reciprocal %361 {approx = true} : vector<64x64xf32> -> vector<64x64xf32>
    %363 = arith.mulf %358, %362 : vector<64x64xf32>
    %c0_61 = arith.constant 0 : index
    %c0_62 = arith.constant 0 : index
    %364 = vector.load %arg11[%c0_61, %c0_62] : memref<64x64xf32, #tpu.memory_space<vmem>>, vector<64x64xf32>
    %365 = arith.truncf %363 : vector<64x64xf32> to vector<64x64xbf16>
    %366 = arith.truncf %364 : vector<64x64xf32> to vector<64x64xbf16>
    %cst_63 = arith.constant dense<0.000000e+00> : vector<64x64xf32>
    %367 = tpu.matmul %365, %366, %cst_63 {dimension_numbers = #tpu.dot_dimension_numbers<[1], [0], [0], [1], [0, 0, 1, 1], [], []>} : vector<64x64xbf16>, vector<64x64xbf16>, vector<64x64xf32> -> vector<64x64xf32>
    %c0_64 = arith.constant 0 : index
    %c0_65 = arith.constant 0 : index
    %368 = vector.load %arg12[%c0_64, %c0_65] : memref<1x64xf32, #tpu.memory_space<vmem>>, vector<1x64xf32>
    %369 = vector.broadcast %368 : vector<1x64xf32> to vector<64x64xf32>
    %370 = arith.addf %367, %369 : vector<64x64xf32>
    %371 = math.absf %370 : vector<64x64xf32>
    %cst_66 = arith.constant 1.000000e+00 : f32
    %372 = vector.broadcast %cst_66 : f32 to vector<64x64xf32>
    %373 = arith.addf %372, %371 : vector<64x64xf32>
    %374 = tpu.reciprocal %373 {approx = true} : vector<64x64xf32> -> vector<64x64xf32>
    %375 = arith.mulf %370, %374 : vector<64x64xf32>
    %c0_67 = arith.constant 0 : index
    %c0_68 = arith.constant 0 : index
    %376 = vector.load %arg13[%c0_67, %c0_68] : memref<64x64xf32, #tpu.memory_space<vmem>>, vector<64x64xf32>
    %377 = arith.truncf %375 : vector<64x64xf32> to vector<64x64xbf16>
    %378 = arith.truncf %376 : vector<64x64xf32> to vector<64x64xbf16>
    %cst_69 = arith.constant dense<0.000000e+00> : vector<64x64xf32>
    %379 = tpu.matmul %377, %378, %cst_69 {dimension_numbers = #tpu.dot_dimension_numbers<[1], [0], [0], [1], [0, 0, 1, 1], [], []>} : vector<64x64xbf16>, vector<64x64xbf16>, vector<64x64xf32> -> vector<64x64xf32>
    %c0_70 = arith.constant 0 : index
    %c0_71 = arith.constant 0 : index
    %380 = vector.load %arg14[%c0_70, %c0_71] : memref<1x64xf32, #tpu.memory_space<vmem>>, vector<1x64xf32>
    %381 = vector.broadcast %380 : vector<1x64xf32> to vector<64x64xf32>
    %382 = arith.addf %379, %381 : vector<64x64xf32>
    %383 = math.absf %382 : vector<64x64xf32>
    %cst_72 = arith.constant 1.000000e+00 : f32
    %384 = vector.broadcast %cst_72 : f32 to vector<64x64xf32>
    %385 = arith.addf %384, %383 : vector<64x64xf32>
    %386 = tpu.reciprocal %385 {approx = true} : vector<64x64xf32> -> vector<64x64xf32>
    %387 = arith.mulf %382, %386 : vector<64x64xf32>
    %c0_73 = arith.constant 0 : index
    %c0_74 = arith.constant 0 : index
    %388 = vector.load %arg15[%c0_73, %c0_74] : memref<64x1xf32, #tpu.memory_space<vmem>>, vector<64x1xf32>
    %389 = arith.truncf %387 : vector<64x64xf32> to vector<64x64xbf16>
    %390 = arith.truncf %388 : vector<64x1xf32> to vector<64x1xbf16>
    %cst_75 = arith.constant dense<0.000000e+00> : vector<64x1xf32>
    %391 = tpu.matmul %389, %390, %cst_75 {dimension_numbers = #tpu.dot_dimension_numbers<[1], [0], [0], [1], [0, 0, 1, 1], [], []>} : vector<64x64xbf16>, vector<64x1xbf16>, vector<64x1xf32> -> vector<64x1xf32>
    %c0_76 = arith.constant 0 : index
    %c0_77 = arith.constant 0 : index
    %392 = vector.load %arg16[%c0_76, %c0_77] : memref<1x1xf32, #tpu.memory_space<vmem>>, vector<1x1xf32>
    %393 = vector.broadcast %392 : vector<1x1xf32> to vector<64x1xf32>
    %394 = arith.addf %391, %393 : vector<64x1xf32>
    %c0_78 = arith.constant 0 : index
    %c0_79 = arith.constant 0 : index
    %395 = vector.load %arg17[%c0_78, %c0_79] : memref<64x1xf32, #tpu.memory_space<vmem>>, vector<64x1xf32>
    tpu.vector_store %arg17[%c0_78, %c0_79], %394 {strides = array<i32>} : memref<64x1xf32, #tpu.memory_space<vmem>>, vector<64x1xf32>,
    return
  }
}

</mosaic_0001>

<bundles_post_ra>
// kernel: lstm_model_forward.1
= control target key start
LH: loop header
LB: loop body
LE: loop exit
PB: predicated region body
PF: predicated region fallthrough
CT: control target
= control target key end

     0   :  { %s3653_s0 = inlined_call_operand.vmem [shape: f32[64,6], index: 0, kind: input, shape index: {}]   ;;  %s3654_s1 = inlined_call_operand.hbm [shape: f32[6,16], index: 1, kind: input, shape index: {}]   ;;  %s3655_s2 = inlined_call_operand.hbm [shape: f32[1,16], index: 2, kind: input, shape index: {}]   ;;  %s3656_s3 = inlined_call_operand.hbm [shape: f32[16,128], index: 3, kind: input, shape index: {}]   ;;  %s3657_s4 = inlined_call_operand.vmem [shape: f32[32,128], index: 4, kind: input, shape index: {}]   ;;  %s3658_s5 = inlined_call_operand.hbm [shape: f32[1,128], index: 5, kind: input, shape index: {}]   ;;  %s3659_s6 = inlined_call_operand.vmem [shape: f32[32,128], index: 6, kind: input, shape index: {}]   ;;  %s3660_s7 = inlined_call_operand.vmem [shape: f32[32,128], index: 7, kind: input, shape index: {}]   ;;  %s3661_s8 = inlined_call_operand.hbm [shape: f32[1,128], index: 8, kind: input, shape index: {}]   ;;  %s3662_s9 = inlined_call_operand.hbm [shape: f32[32,64], index: 9, kind: input, shape index: {}]   ;;  %s3663_s10 = inlined_call_operand.hbm [shape: f32[1,64], index: 10, kind: input, shape index: {}]   ;;  %s3664_s11 = inlined_call_operand.vmem [shape: f32[64,64], index: 11, kind: input, shape index: {}]   ;;  %s3665_s12 = inlined_call_operand.hbm [shape: f32[1,64], index: 12, kind: input, shape index: {}]   ;;  %s3666_s13 = inlined_call_operand.vmem [shape: f32[64,64], index: 13, kind: input, shape index: {}]   ;;  %s3667_s14 = inlined_call_operand.hbm [shape: f32[1,64], index: 14, kind: input, shape index: {}]   ;;  %s3668_s15 = inlined_call_operand.vmem [shape: f32[64,1], index: 15, kind: input, shape index: {}]   ;;  %s3669_s16 = inlined_call_operand.<no memory space> [shape: f32[1,1], index: 16, kind: input, shape index: {}]   ;;  %s3670_s17 = inlined_call_operand.vmem [shape: f32[64,1], index: 17, kind: output, shape index: {}]  }
   0x1   :  { %3673 = sst [smem:[#allocation22_spill]] %s3653_s0  ;;  %v22_v0 = vstv %s3669_s16 }
   0x2   :  { %3674 = sst [smem:[#allocation23_spill]] %s3654_s1  ;;  %23 = vst [vmem:[#allocation2] sm:$0x1] %v22_v0 }
   0x3   :  { %24 = vsyncpa [#allocation4], 0 }
   0x4   :  { %25 = vsyncpa [#allocation6], 0 }
   0x5   :  { %26 = vsyncpa [#allocation9], 0 }
   0x6   :  { %27 = vsyncpa [#allocation12], 0 }
   0x7   :  { %28 = vsyncpa [#allocation15], 0  ;;  %s2923_s26 = smov [#allocation5]   ;;  %s2924_s28 = smov [#allocation8]  }
   0x8   :  { %s47_s27 = sshll.u32 %s2923_s26, 4  ;;  %s71_s29 = sshll.u32 %s2924_s28, 4  ;;  %s48_s27 = int_to_ptr.vmem [resolvable:$true] %s47_s27  ;;  %s72_s29 = int_to_ptr.vmem [resolvable:$true] %s71_s29 }
   0x9   :  { %s2715_s18 = scalar_lea.hbm %s3655_s2, 16 }
   0xa   :  { %p2716_p0 = scmp.ne.s32.totalorder %s3655_s2, %s2715_s18  ;;  %p2719_p1 = scmp.lt.u32.totalorder %s2715_s18, %s3655_s2 }
   0xc   :  { %p2721_p2 = pnand %p2719_p1, %p2716_p0 }
   0xe   :  { %2724 = shalt.err (!%p2721_p2)
}
   0xf   :  { %s2725_s21 = scalar_lea.vmem %s48_s27, 16  ;;  %s2729_s22 = scalar_lea.vmem %s48_s27, 32 }
  0x10   :  { %p2726_p3 = scmp.ne.s32.totalorder %s48_s27, %s2725_s21  ;;  %p2730_p4 = scmp.lt.s32.totalorder %s48_s27, %s48_s27 }
  0x11   :  { %p2731_p5 = scmp.lt.s32.totalorder %s2729_s22, %s2725_s21 }
  0x13   :  { %p2732_p6 = por %p2731_p5, %p2730_p4 }
  0x15   :  { %p2733_p7 = pnand %p2732_p6, %p2726_p3 }
  0x17   :  { %2736 = shalt.err (!%p2733_p7)
}
  0x18   :  { %50 = dma.hbm_to_vmem [thread:$0]  %s3655_s2, 16, %s48_s27, [#allocation6]  }
  0x19   :  { %s2737_s28 = scalar_lea.hbm %s3658_s5, 16 }
  0x1a   :  { %p2738_p8 = scmp.ne.s32.totalorder %s3658_s5, %s2737_s28  ;;  %p2741_p9 = scmp.lt.u32.totalorder %s2737_s28, %s3658_s5 }
  0x1c   :  { %p2743_p10 = pnand %p2741_p9, %p2738_p8 }
  0x1e   :  { %2746 = shalt.err (!%p2743_p10)
}
  0x1f   :  { %s2747_s1 = scalar_lea.vmem %s72_s29, 16  ;;  %s2751_s16 = scalar_lea.vmem %s72_s29, 32 }
  0x20   :  { %p2748_p11 = scmp.ne.s32.totalorder %s72_s29, %s2747_s1  ;;  %p2752_p12 = scmp.lt.s32.totalorder %s72_s29, %s72_s29 }
  0x21   :  { %p2753_p13 = scmp.lt.s32.totalorder %s2751_s16, %s2747_s1 }
  0x23   :  { %p2754_p0 = por %p2753_p13, %p2752_p12 }
  0x25   :  { %p2755_p1 = pnand %p2754_p0, %p2748_p11 }
  0x27   :  { %2758 = shalt.err (!%p2755_p1)
}
  0x28   :  { %74 = dma.hbm_to_vmem [thread:$0]  %s3658_s5, 16, %s72_s29, [#allocation9]  }
  0x29   :  { %s2925_s20 = smov [#allocation11]   ;;  %s2926_s22 = smov [#allocation14]  }
  0x2a   :  { %s94_s21 = sshll.u32 %s2925_s20, 4  ;;  %s119_s23 = sshll.u32 %s2926_s22, 4  ;;  %s95_s21 = int_to_ptr.vmem [resolvable:$true] %s94_s21  ;;  %s3056_s23 = int_to_ptr.vmem [resolvable:$true] %s119_s23 }
  0x2b   :  { %s2759_s26 = scalar_lea.hbm %s3662_s9, 512 }
  0x2c   :  { %p2760_p2 = scmp.ne.s32.totalorder %s3662_s9, %s2759_s26  ;;  %p2763_p3 = scmp.lt.u32.totalorder %s2759_s26, %s3662_s9 }
  0x2e   :  { %p2765_p4 = pnand %p2763_p3, %p2760_p2 }
  0x30   :  { %2768 = shalt.err (!%p2765_p4)
}
  0x31   :  { %s2769_s5 = scalar_lea.vmem %s95_s21, 512  ;;  %p2774_p6 = scmp.lt.s32.totalorder %s95_s21, %s95_s21 }
  0x32   :  { %p2770_p5 = scmp.ne.s32.totalorder %s95_s21, %s2769_s5  ;;  %p2775_p7 = scmp.lt.s32.totalorder %s2769_s5, %s2769_s5 }
  0x34   :  { %p2776_p8 = por %p2775_p7, %p2774_p6 }
  0x36   :  { %p2777_p9 = pnand %p2776_p8, %p2770_p5 }
  0x38   :  { %2780 = shalt.err (!%p2777_p9)
}
  0x39   :  { %s2927_s29 = smov 128   ;;  %s2928_s19 = smov 8  }
  0x3a   :  { %100 = dma.hbm_to_vmem [thread:$0]  %s3662_s9, 512, %s95_s21, [#allocation12], %s2927_s29, %s2927_s29, %s2928_s19  }
  0x3b   :  { %s2781_s20 = scalar_lea.hbm %s3665_s12, 16 }
  0x3c   :  { %p2782_p10 = scmp.ne.s32.totalorder %s3665_s12, %s2781_s20  ;;  %p2785_p11 = scmp.lt.u32.totalorder %s2781_s20, %s3665_s12 }
  0x3e   :  { %p2787_p12 = pnand %p2785_p11, %p2782_p10 }
  0x40   :  { %2790 = shalt.err (!%p2787_p12)
}
  0x41   :  { %s2791_s28 = scalar_lea.vmem %s3056_s23, 16  ;;  %s2795_s9 = scalar_lea.vmem %s3056_s23, 32 }
  0x42   :  { %p2792_p13 = scmp.ne.s32.totalorder %s3056_s23, %s2791_s28  ;;  %p2796_p0 = scmp.lt.s32.totalorder %s3056_s23, %s3056_s23 }
  0x43   :  { %p2797_p1 = scmp.lt.s32.totalorder %s2795_s9, %s2791_s28 }
  0x45   :  { %p2798_p2 = por %p2797_p1, %p2796_p0 }
  0x47   :  { %p2799_p3 = pnand %p2798_p2, %p2792_p13 }
  0x49   :  { %2802 = shalt.err (!%p2799_p3)
}
  0x4a   :  { %122 = dma.hbm_to_vmem [thread:$0]  %s3665_s12, 16, %s3056_s23, [#allocation15]  }
  0x4b   :  { %s2929_s30 = smov [#allocation3]   ;;  %s2930_s5 = smov [#allocation7]  }
  0x4c   :  { %s37_s18 = sshll.u32 %s2929_s30, 4  ;;  %s56_s1 = sshll.u32 %s2930_s5, 4  ;;  %s38_s18 = int_to_ptr.vmem [resolvable:$true] %s37_s18  ;;  %s3091_s1 = int_to_ptr.vmem [resolvable:$true] %s56_s1 }
  0x4d   :  { %s3675_s27 = sld [smem:[#allocation23_spill]] }
  0x53   :  { %s2803_s20 = scalar_lea.hbm %s3675_s27, 128 }
  0x54   :  { %p2804_p4 = scmp.ne.s32.totalorder %s3675_s27, %s2803_s20  ;;  %p2807_p5 = scmp.lt.u32.totalorder %s2803_s20, %s3675_s27 }
  0x56   :  { %p2809_p6 = pnand %p2807_p5, %p2804_p4 }
  0x58   :  { %2812 = shalt.err (!%p2809_p6)
}
  0x59   :  { %s2813_s12 = scalar_lea.vmem %s38_s18, 128  ;;  %p2818_p8 = scmp.lt.s32.totalorder %s38_s18, %s38_s18 }
  0x5a   :  { %p2814_p7 = scmp.ne.s32.totalorder %s38_s18, %s2813_s12  ;;  %p2819_p9 = scmp.lt.s32.totalorder %s2813_s12, %s2813_s12 }
  0x5c   :  { %p2820_p10 = por %p2819_p9, %p2818_p8 }
  0x5e   :  { %p2821_p11 = pnand %p2820_p10, %p2814_p7 }
  0x60   :  { %2824 = shalt.err (!%p2821_p11)
}
  0x61   :  { %40 = dma.hbm_to_vmem [thread:$0]  %s3675_s27, 128, %s38_s18, [#allocation4]  }
  0x62   :  { %s2825_s0 = scalar_lea.hbm %s3656_s3, 256 }
  0x63   :  { %p2826_p12 = scmp.ne.s32.totalorder %s3656_s3, %s2825_s0  ;;  %p2829_p13 = scmp.lt.u32.totalorder %s2825_s0, %s3656_s3 }
  0x65   :  { %p2831_p0 = pnand %p2829_p13, %p2826_p12 }
  0x67   :  { %2834 = shalt.err (!%p2831_p0)
}
  0x68   :  { %s2835_s20 = scalar_lea.vmem %s3091_s1, 256  ;;  %p2840_p2 = scmp.lt.s32.totalorder %s3091_s1, %s3091_s1 }
  0x69   :  { %p2836_p1 = scmp.ne.s32.totalorder %s3091_s1, %s2835_s20  ;;  %p2841_p3 = scmp.lt.s32.totalorder %s2835_s20, %s2835_s20 }
  0x6b   :  { %p2842_p4 = por %p2841_p3, %p2840_p2 }
  0x6d   :  { %p2843_p5 = pnand %p2842_p4, %p2836_p1 }
  0x6f   :  { %2846 = shalt.err (!%p2843_p5)
}
  0x70   :  { %62 = dma.hbm_to_vmem [thread:$0]  %s3656_s3, 256, %s3091_s1, [#allocation6], %s2927_s29, %s2927_s29, %s2928_s19  }
  0x71   :  { %s2931_s22 = smov [#allocation10]   ;;  %s2932_s25 = smov [#allocation13]  }
  0x72   :  { %s85_s24 = sshll.u32 %s2931_s22, 4  ;;  %s107_s26 = sshll.u32 %s2932_s25, 4  ;;  %s86_s24 = int_to_ptr.vmem [resolvable:$true] %s85_s24  ;;  %s108_s26 = int_to_ptr.vmem [resolvable:$true] %s107_s26 }
  0x73   :  { %s2847_s28 = scalar_lea.hbm %s3661_s8, 16 }
  0x74   :  { %p2848_p6 = scmp.ne.s32.totalorder %s3661_s8, %s2847_s28  ;;  %p2851_p7 = scmp.lt.u32.totalorder %s2847_s28, %s3661_s8 }
  0x76   :  { %p2853_p8 = pnand %p2851_p7, %p2848_p6 }
  0x78   :  { %2856 = shalt.err (!%p2853_p8)
}
  0x79   :  { %s2857_s3 = scalar_lea.vmem %s86_s24, 16  ;;  %s2861_s29 = scalar_lea.vmem %s86_s24, 32 }
  0x7a   :  { %p2858_p9 = scmp.ne.s32.totalorder %s86_s24, %s2857_s3  ;;  %p2862_p10 = scmp.lt.s32.totalorder %s86_s24, %s86_s24 }
  0x7b   :  { %p2863_p11 = scmp.lt.s32.totalorder %s2861_s29, %s2857_s3 }
  0x7d   :  { %p2864_p12 = por %p2863_p11, %p2862_p10 }
  0x7f   :  { %p2865_p13 = pnand %p2864_p12, %p2858_p9 }
  0x81   :  { %2868 = shalt.err (!%p2865_p13)
}
  0x82   :  { %88 = dma.hbm_to_vmem [thread:$0]  %s3661_s8, 16, %s86_s24, [#allocation9]  }
  0x83   :  { %s2869_s2 = scalar_lea.hbm %s3663_s10, 16 }
  0x84   :  { %p2870_p0 = scmp.ne.s32.totalorder %s3663_s10, %s2869_s2  ;;  %p2873_p1 = scmp.lt.u32.totalorder %s2869_s2, %s3663_s10 }
  0x86   :  { %p2875_p2 = pnand %p2873_p1, %p2870_p0 }
  0x88   :  { %2878 = shalt.err (!%p2875_p2)
}
  0x89   :  { %s2879_s25 = scalar_lea.vmem %s108_s26, 16  ;;  %s2883_s12 = scalar_lea.vmem %s108_s26, 32 }
  0x8a   :  { %p2880_p3 = scmp.ne.s32.totalorder %s108_s26, %s2879_s25  ;;  %p2884_p4 = scmp.lt.s32.totalorder %s108_s26, %s108_s26 }
  0x8b   :  { %p2885_p5 = scmp.lt.s32.totalorder %s2883_s12, %s2879_s25 }
  0x8d   :  { %p2886_p6 = por %p2885_p5, %p2884_p4 }
  0x8f   :  { %p2887_p7 = pnand %p2886_p6, %p2880_p3 }
  0x91   :  { %2890 = shalt.err (!%p2887_p7)
}
  0x92   :  { %110 = dma.hbm_to_vmem [thread:$0]  %s3663_s10, 16, %s108_s26, [#allocation12]  }
  0x93   :  { %s2933_s23 = smov [#allocation16]   ;;  %s2891_s0 = scalar_lea.hbm %s3667_s14, 16 }
  0x94   :  { %s131_s28 = sshll.u32 %s2933_s23, 4  ;;  %p2892_p8 = scmp.ne.s32.totalorder %s3667_s14, %s2891_s0  ;;  %s132_s28 = int_to_ptr.vmem [resolvable:$true] %s131_s28 }
  0x95   :  { %p2895_p9 = scmp.lt.u32.totalorder %s2891_s0, %s3667_s14 }
  0x97   :  { %p2897_p10 = pnand %p2895_p9, %p2892_p8 }
  0x99   :  { %2900 = shalt.err (!%p2897_p10)
}
  0x9a   :  { %s2901_s1 = scalar_lea.vmem %s132_s28, 16  ;;  %s2905_s10 = scalar_lea.vmem %s132_s28, 32 }
  0x9b   :  { %p2902_p11 = scmp.ne.s32.totalorder %s132_s28, %s2901_s1  ;;  %p2906_p12 = scmp.lt.s32.totalorder %s132_s28, %s132_s28 }
  0x9c   :  { %p2907_p13 = scmp.lt.s32.totalorder %s2905_s10, %s2901_s1 }
  0x9e   :  { %p2908_p0 = por %p2907_p13, %p2906_p12 }
  0xa0   :  { %p2909_p1 = pnand %p2908_p0, %p2902_p11 }
  0xa2   :  { %2912 = shalt.err (!%p2909_p1)
}
  0xa3   :  { %134 = dma.hbm_to_vmem [thread:$0]  %s3667_s14, 16, %s132_s28, [#allocation15]  }
  0xa4   :  { %2913 = dma.done.wait [#allocation4], 128  }
  0xa5   :  { %2914 = vsyncadd [#allocation4], 4294967168 }
  0xa6   :  { %2915 = dma.done.wait [#allocation6], 272  }
  0xa7   :  { %2916 = vsyncadd [#allocation6], 4294967024 }
  0xa8   :  { %2917 = dma.done.wait [#allocation9], 32  }
  0xa9   :  { %2918 = vsyncadd [#allocation9], 4294967264 }
  0xaa   :  { %2919 = dma.done.wait [#allocation12], 528  }
  0xab   :  { %2920 = vsyncadd [#allocation12], 4294966768 }
  0xac   :  { %2921 = dma.done.wait [#allocation15], 32  }
  0xad   :  { %2922 = vsyncadd [#allocation15], 4294967264  ;;  %v175_v1 = vld [vmem:[#allocation3] sm:$0x3f]  ;;  %vm201_vm0 = vcmask 1042432   ;;  %s3676_s20 = sld [smem:[#allocation22_spill]] }
  0xae   :  { %vm188_vm1 = vcmask 48128   ;;  %v180_v4 = vpack.c.bf16 %v175_v1, %v175_v1  ;;  %v272_v10 = vld [vmem:[%s3657_s4] sm:$0xff]  ;;  %v273_v11 = vld [vmem:[%s3657_s4 + $0x8] sm:$0xff]  ;;  %v2934_v16 = vmov 0.0   ;;  %v271_v21 = vld [vmem:[#allocation7 + $0x8] sm:$0xff]  ;;  %vm2935_vm2 = vmmov 0  }
  0xaf   :  { %v3186_v15 = vpack.c.bf16 %v273_v11, %v272_v10  ;;  %v270_v20 = vld [vmem:[#allocation7] sm:$0xff]  ;;  %v275_v23 = vld [vmem:[%s3657_s4 + $0x18] sm:$0xff]  ;;  %v2936_v26 = vmov 0   ;;  %v2143_v28 = vld [vmem:[#allocation5] ss:$0 sm:$0xff]  ;;  %vm288_vm3 = vcmask 130048  }
  0xb0   :  { %2522 = vmatprep.subr.msk.bf16.mxu0 %vm201_vm0, %v180_v4  ;;  %v203_v12 = vsel %vm201_vm0, %v180_v4, 0  ;;  %v274_v22 = vld [vmem:[%s3657_s4 + $0x10] sm:$0xff]  ;;  %v281_v24 = vpack.c.bf16 %v271_v21, %v270_v20  ;;  %v2148_v52 = vld [vmem:[#allocation8] ss:$0 sm:$0xff]  ;;  %s2937_s4 = smov 32   ;;  %s2938_s2 = smov 64  }
  0xb1   :  { %2303 = vmatpush3.bf16.msra.mxu0 %v203_v12  ;;  %v3206_v25 = vpack.c.bf16 %v275_v23, %v274_v22  ;;  %vm368_vm4 = vcmask 261120   ;;  %vm1783_vm5 = vcmask 523264   ;;  %vm2125_vm6 = vcmask 7168  }
  0xb2   :  { %2322 = vmatprep.subr.bf16.mxu0 %v2934_v16  ;;  %2312 = vmatprep.subr.bf16.mxu1 %v281_v24 }
  0xb3   :  { %v167_v2 = vld [vmem:[%s3676_s20] sm:$0xff]  ;;  %v168_v3 = vld [vmem:[%s3676_s20 + $0x8] sm:$0xff]  ;;  %v169_v6 = vld [vmem:[%s3676_s20 + $0x10] sm:$0xff]  ;;  %2313 = vmatpush3.bf16.msra.mxu1 %v281_v24 }
  0xb4   :  { %v176_v5 = vpack.c.bf16 %v168_v3, %v167_v2  ;;  %v170_v7 = vld [vmem:[%s3676_s20 + $0x18] sm:$0xff]  ;;  %v171_v8 = vld [vmem:[%s3676_s20 + $0x20] sm:$0xff]  ;;  %v172_v9 = vld [vmem:[%s3676_s20 + $0x28] sm:$0xff]  ;;  %2330 = vmatprep.subr.bf16.mxu1 %v2934_v16 }
  0xb5   :  { %v177_v13 = vpack.c.bf16 %v170_v7, %v169_v6  ;;  %v178_v14 = vpack.c.bf16 %v172_v9, %v171_v8  ;;  %v173_v17 = vld [vmem:[%s3676_s20 + $0x30] sm:$0xff]  ;;  %v174_v18 = vld [vmem:[%s3676_s20 + $0x38] sm:$0xff] }
  0xb6   :  { %2304 = vmatprep.mubr.msk.bf16.mxu0 %vm188_vm1, %v176_v5  ;;  %v179_v19 = vpack.c.bf16 %v174_v18, %v173_v17 }
  0xb7   :  { %2305 = vmatmul.mubr.msk.bf16.vlgmr.msra.gmra.mrb[0].mxu0 %vm188_vm1, %v177_v13 }
  0xb8   :  { %2308 = vmatprep.mubr.msk.bf16.mxu0 %vm188_vm1, %v178_v14  ;;  %2323 = vmatpush3.bf16.msra.mxu0 %v3186_v15 }
  0xb9   :  { %2324 = vmatprep.subr.bf16.mxu0 %v2934_v16 }
  0xbc   :  { %2325 = vmatpush3.bf16.msra.mxu0 %v3206_v25 }
  0xbd   :  { %2338 = vmatprep.subr.bf16.mxu0 %v2934_v16 }
  0xbf   :  { %2309 = vmatmul.mubr.msk.bf16.gmra.mrb[4].mxu0 %vm188_vm1, %v179_v19 }
  0xc0   :  { %2326 = vmatprep.mubr.msk.bf16.mxu0 %vm2935_vm2, %v2934_v16 }
  0xc7   :  { %2327 = vmatmul.mubr.bf16.vlgmr.msra.gmra.mrb[8].mxu0 %v2936_v26 }
  0xc8   :  { %2339 = vmatpush3.bf16.msra.mxu0 %v3186_v15  ;;  %2342 = vmatprep.mubr.msk.bf16.mxu0 %vm2935_vm2, %v2934_v16 }
  0xc9   :  { %2340 = vmatprep.subr.bf16.mxu0 %v2934_v16 }
  0xcc   :  { %2341 = vmatpush3.bf16.msra.mxu0 %v3206_v25 }
  0xcd   :  { %2354 = vmatprep.subr.bf16.mxu0 %v2934_v16 }
 0x18a   :  { %v2306_v27 = vpop.f32.mrb[0].mxu0 }
 0x18b   :  { %v239_v29 = vpop.f32.mrb[1].mxu0  ;;  %v248_v31 = vadd.f32 %v2306_v27, %v2143_v28 }
 0x18c   :  { %v2307_v30 = vpop.f32.mrb[2].mxu0  ;;  %v240_v34 = vadd.f32 %v2143_v28, %v239_v29 }
 0x18d   :  { %v251_v32 = vadd.f32 %v2307_v30, %v2143_v28  ;;  %v242_v33 = vpop.f32.mrb[3].mxu0 }
 0x18e   :  { %v243_v35 = vadd.f32 %v2143_v28, %v242_v33 }
 0x18f   :  { %v278_v36 = vpack.c.bf16 %v251_v32, %v248_v31 }
 0x190   :  { %v277_v37 = vpack.c.bf16 %v243_v35, %v240_v34 }
 0x192   :  { %2314 = vmatprep.mubr.msk.bf16.mxu1 %vm288_vm3, %v277_v37  ;;  %v2310_v38 = vpop.f32.mrb[4].mxu0 }
 0x193   :  { %2315 = vmatmul.mubr.msk.bf16.vlgmr.msra.gmra.mrb[0].mxu1 %vm288_vm3, %v278_v36  ;;  %v264_v39 = vadd.f32 %v2310_v38, %v2143_v28  ;;  %v255_v40 = vpop.f32.mrb[5].mxu0 }
 0x194   :  { %v256_v41 = vadd.f32 %v2143_v28, %v255_v40  ;;  %v2311_v42 = vpop.f32.mrb[6].mxu0  ;;  %2331 = vmatpush3.bf16.msra.mxu1 %v3186_v15 }
 0x195   :  { %v267_v43 = vadd.f32 %v2311_v42, %v2143_v28  ;;  %v258_v44 = vpop.f32.mrb[7].mxu0  ;;  %2332 = vmatprep.subr.bf16.mxu1 %v2934_v16 }
 0x196   :  { %v259_v45 = vadd.f32 %v2143_v28, %v258_v44 }
 0x197   :  { %v280_v46 = vpack.c.bf16 %v267_v43, %v264_v39 }
 0x198   :  { %v279_v47 = vpack.c.bf16 %v259_v45, %v256_v41  ;;  %2333 = vmatpush3.bf16.msra.mxu1 %v3206_v25 }
 0x199   :  { %2346 = vmatprep.subr.bf16.mxu1 %v2934_v16 }
 0x19a   :  { %2318 = vmatprep.mubr.msk.bf16.mxu1 %vm288_vm3, %v279_v47  ;;  %v406_v48 = vpop.f32.mrb[8].mxu0 }
 0x19b   :  { %2319 = vmatmul.mubr.msk.bf16.gmra.mrb[4].mxu1 %vm288_vm3, %v280_v46  ;;  %v2328_v49 = vpop.f32.mrb[9].mxu0 }
 0x19c   :  { %2334 = vmatprep.mubr.msk.bf16.mxu1 %vm2935_vm2, %v2934_v16  ;;  %v409_v50 = vpop.f32.mrb[10].mxu0 }
 0x19d   :  { %v2329_v51 = vpop.f32.mrb[11].mxu0 }
 0x266   :  { %v2316_v53 = vpop.f32.mrb[0].mxu1 }
 0x267   :  { %v3230_v54 = vadd.f32 %v2316_v53, %v2148_v52  ;;  %v335_v55 = vpop.f32.mrb[1].mxu1 }
 0x268   :  { %v336_v56 = vadd.f32 %v2148_v52, %v335_v55  ;;  %v2317_v57 = vpop.f32.mrb[2].mxu1 }
 0x269   :  { %v3232_v58 = vadd.f32 %v2317_v57, %v2148_v52  ;;  %v338_v59 = vpop.f32.mrb[3].mxu1 }
 0x26a   :  { %v412_v60 = vadd.f32 %v406_v48, %v336_v56  ;;  %v339_v61 = vadd.f32 %v2148_v52, %v338_v59 }
 0x26c   :  { %2539 = vtanh.f32 %v412_v60  ;;  %v2153_v7 = vmul.f32 -1.442695, %v412_v60 }
 0x26e   :  { %v2320_v62 = vpop.f32.mrb[4].mxu1  ;;  %2541 = vpow2.f32 %v2153_v7 }
 0x26f   :  { %v3234_v63 = vadd.f32 %v2320_v62, %v2148_v52  ;;  %v351_v0 = vpop.f32.mrb[5].mxu1 }
 0x270   :  { %v3236_v1 = vadd.f32 %v2148_v52, %v351_v0  ;;  %v2321_v2 = vpop.f32.mrb[6].mxu1 }
 0x271   :  { %v3238_v3 = vadd.f32 %v2321_v2, %v2148_v52  ;;  %v354_v4 = vpop.f32.mrb[7].mxu1 }
 0x272   :  { %v3240_v5 = vadd.f32 %v2148_v52, %v354_v4 }
 0x276   :  { %v2540_v6 = vpop.eup %2539 }
 0x277   :  { %422 = vrot.lane.b32.xlu0 %v2540_v6, %s2937_s4 }
 0x278   :  { %v2542_v8 = vpop.eup %2541 }
 0x279   :  { %v416_v9 = vadd.f32 1.0, %v2542_v8 }
 0x27b   :  { %2543 = vrcp.f32 %v416_v9 }
 0x285   :  { %v2544_v10 = vpop.eup %2543 }
 0x286   :  { %v420_v13 = vmul.f32 0.0, %v2544_v10 }
 0x2e9   :  { %v423_v11 = vpop.permute.xlu0 %422 }
 0x2ea   :  { %v425_v12 = vmul.f32 %v2544_v10, %v423_v11 }
 0x2ec   :  { %427 = vrot.lane.b32.xlu0 %v425_v12, %s2937_s4 }
 0x35e   :  { %v428_v14 = vpop.permute.xlu0 %427 }
 0x35f   :  { %v430_v17 = vadd.f32 %v428_v14, %v420_v13 }
 0x361   :  { %2545 = vtanh.f32 %v430_v17 }
 0x36b   :  { %v2546_v18 = vpop.eup %2545 }
 0x36c   :  { %433 = vrot.lane.b32.xlu1 %v2546_v18, %s2937_s4 }
 0x3de   :  { %v434_v19 = vpop.permute.xlu1 %433 }
 0x3df   :  { %v3245_v20 = vmul.f32 %v2544_v10, %v434_v19 }
 0x3e1   :  { %v437_v21 = vpack.c.bf16 %v3245_v20, %v3245_v20 }
 0x3e3   :  { %439 = vrot.lane.b32.xlu1 %v437_v21, %s2938_s2 }
 0x455   :  { %v440_v22 = vpop.permute.xlu1 %439 }
 0x456   :  { %2335 = vmatmul.mubr.msk.bf16.vlgmr.msra.gmra.mrb[8].mxu1 %vm368_vm4, %v440_v22 }
 0x457   :  { %2347 = vmatpush3.bf16.msra.mxu1 %v3186_v15  ;;  %2350 = vmatprep.mubr.msk.bf16.mxu1 %vm2935_vm2, %v2934_v16 }
 0x458   :  { %2348 = vmatprep.subr.bf16.mxu1 %v2934_v16 }
 0x45b   :  { %2349 = vmatpush3.bf16.msra.mxu1 %v3206_v25 }
 0x45c   :  { %2362 = vmatprep.subr.bf16.mxu1 %v2934_v16 }
 0x529   :  { %v478_v23 = vpop.f32.mrb[8].mxu1 }
 0x52a   :  { %v484_v24 = vadd.f32 %v478_v23, %v339_v61  ;;  %v2336_v27 = vpop.f32.mrb[9].mxu1 }
 0x52b   :  { %v481_v28 = vpop.f32.mrb[10].mxu1 }
 0x52c   :  { %2547 = vtanh.f32 %v484_v24  ;;  %v2337_v29 = vpop.f32.mrb[11].mxu1  ;;  %v2155_v31 = vmul.f32 -1.442695, %v484_v24 }
 0x52e   :  { %2549 = vpow2.f32 %v2155_v31 }
 0x536   :  { %v2548_v30 = vpop.eup %2547 }
 0x537   :  { %494 = vrot.lane.b32.xlu0 %v2548_v30, %s2937_s4 }
 0x538   :  { %v2550_v32 = vpop.eup %2549 }
 0x539   :  { %v488_v33 = vadd.f32 1.0, %v2550_v32 }
 0x53b   :  { %2551 = vrcp.f32 %v488_v33 }
 0x545   :  { %v2552_v34 = vpop.eup %2551 }
 0x546   :  { %v492_v37 = vmul.f32 %v2552_v34, %v430_v17 }
 0x5a9   :  { %v495_v35 = vpop.permute.xlu0 %494 }
 0x5aa   :  { %v497_v36 = vmul.f32 %v2552_v34, %v495_v35 }
 0x5ac   :  { %499 = vrot.lane.b32.xlu1 %v497_v36, %s2937_s4 }
 0x61e   :  { %v500_v38 = vpop.permute.xlu1 %499 }
 0x61f   :  { %v502_v39 = vadd.f32 %v500_v38, %v492_v37 }
 0x621   :  { %2553 = vtanh.f32 %v502_v39 }
 0x62b   :  { %v2554_v40 = vpop.eup %2553 }
 0x62c   :  { %505 = vrot.lane.b32.xlu0 %v2554_v40, %s2937_s4 }
 0x69e   :  { %v506_v41 = vpop.permute.xlu0 %505 }
 0x69f   :  { %v3260_v42 = vmul.f32 %v2552_v34, %v506_v41 }
 0x6a1   :  { %v509_v43 = vpack.c.bf16 %v3260_v42, %v3260_v42 }
 0x6a3   :  { %511 = vrot.lane.b32.xlu1 %v509_v43, %s2938_s2 }
 0x715   :  { %v512_v44 = vpop.permute.xlu1 %511 }
 0x716   :  { %2343 = vmatmul.mubr.msk.bf16.vlgmr.msra.gmra.mrb[12].mxu0 %vm368_vm4, %v512_v44 }
 0x717   :  { %2355 = vmatpush3.bf16.msra.mxu0 %v3186_v15  ;;  %2358 = vmatprep.mubr.msk.bf16.mxu0 %vm2935_vm2, %v2934_v16 }
 0x718   :  { %2356 = vmatprep.subr.bf16.mxu0 %v2934_v16 }
 0x71b   :  { %2357 = vmatpush3.bf16.msra.mxu0 %v3206_v25 }
 0x71c   :  { %2370 = vmatprep.subr.bf16.mxu0 %v2934_v16 }
 0x7e9   :  { %v550_v45 = vpop.f32.mrb[12].mxu0 }
 0x7ea   :  { %v556_v46 = vadd.f32 %v550_v45, %v3230_v54  ;;  %v2344_v47 = vpop.f32.mrb[13].mxu0 }
 0x7eb   :  { %v553_v48 = vpop.f32.mrb[14].mxu0 }
 0x7ec   :  { %2555 = vtanh.f32 %v556_v46  ;;  %v2345_v49 = vpop.f32.mrb[15].mxu0  ;;  %v2157_v51 = vmul.f32 -1.442695, %v556_v46 }
 0x7ee   :  { %2557 = vpow2.f32 %v2157_v51 }
 0x7f6   :  { %v2556_v50 = vpop.eup %2555 }
 0x7f7   :  { %566 = vrot.lane.b32.xlu0 %v2556_v50, %s2937_s4 }
 0x7f8   :  { %v2558_v52 = vpop.eup %2557 }
 0x7f9   :  { %v560_v53 = vadd.f32 1.0, %v2558_v52 }
 0x7fb   :  { %2559 = vrcp.f32 %v560_v53 }
 0x805   :  { %v2560_v55 = vpop.eup %2559 }
 0x806   :  { %v564_v59 = vmul.f32 %v2560_v55, %v502_v39 }
 0x869   :  { %v567_v56 = vpop.permute.xlu0 %566 }
 0x86a   :  { %v569_v57 = vmul.f32 %v2560_v55, %v567_v56 }
 0x86c   :  { %571 = vrot.lane.b32.xlu1 %v569_v57, %s2937_s4 }
 0x8de   :  { %v572_v60 = vpop.permute.xlu1 %571 }
 0x8df   :  { %v574_v54 = vadd.f32 %v572_v60, %v564_v59 }
 0x8e1   :  { %2561 = vtanh.f32 %v574_v54 }
 0x8eb   :  { %v2562_v61 = vpop.eup %2561 }
 0x8ec   :  { %577 = vrot.lane.b32.xlu0 %v2562_v61, %s2937_s4 }
 0x95e   :  { %v578_v62 = vpop.permute.xlu0 %577 }
 0x95f   :  { %v3276_v0 = vmul.f32 %v2560_v55, %v578_v62 }
 0x961   :  { %v581_v2 = vpack.c.bf16 %v3276_v0, %v3276_v0 }
 0x963   :  { %583 = vrot.lane.b32.xlu1 %v581_v2, %s2938_s2 }
 0x9d5   :  { %v584_v4 = vpop.permute.xlu1 %583 }
 0x9d6   :  { %2351 = vmatmul.mubr.msk.bf16.vlgmr.msra.gmra.mrb[12].mxu1 %vm368_vm4, %v584_v4 }
 0x9d7   :  { %2363 = vmatpush3.bf16.msra.mxu1 %v3186_v15  ;;  %2366 = vmatprep.mubr.msk.bf16.mxu1 %vm2935_vm2, %v2934_v16 }
 0x9d8   :  { %2364 = vmatprep.subr.bf16.mxu1 %v2934_v16 }
 0x9db   :  { %2365 = vmatpush3.bf16.msra.mxu1 %v3206_v25 }
 0x9dc   :  { %2378 = vmatprep.subr.bf16.mxu1 %v2934_v16 }
 0xaa9   :  { %v622_v6 = vpop.f32.mrb[12].mxu1 }
 0xaaa   :  { %v628_v7 = vadd.f32 %v622_v6, %v3232_v58  ;;  %v2352_v8 = vpop.f32.mrb[13].mxu1 }
 0xaab   :  { %v625_v9 = vpop.f32.mrb[14].mxu1 }
 0xaac   :  { %2563 = vtanh.f32 %v628_v7  ;;  %v2353_v10 = vpop.f32.mrb[15].mxu1  ;;  %v2159_v12 = vmul.f32 -1.442695, %v628_v7 }
 0xaae   :  { %2565 = vpow2.f32 %v2159_v12 }
 0xab6   :  { %v2564_v11 = vpop.eup %2563 }
 0xab7   :  { %638 = vrot.lane.b32.xlu0 %v2564_v11, %s2937_s4 }
 0xab8   :  { %v2566_v13 = vpop.eup %2565 }
 0xab9   :  { %v632_v14 = vadd.f32 1.0, %v2566_v13 }
 0xabb   :  { %2567 = vrcp.f32 %v632_v14 }
 0xac5   :  { %v2568_v17 = vpop.eup %2567 }
 0xac6   :  { %v636_v21 = vmul.f32 %v2568_v17, %v574_v54 }
 0xb29   :  { %v639_v18 = vpop.permute.xlu0 %638 }
 0xb2a   :  { %v641_v19 = vmul.f32 %v2568_v17, %v639_v18 }
 0xb2c   :  { %643 = vrot.lane.b32.xlu1 %v641_v19, %s2937_s4 }
 0xb9e   :  { %v644_v22 = vpop.permute.xlu1 %643 }
 0xb9f   :  { %v646_v58 = vadd.f32 %v644_v22, %v636_v21 }
 0xba1   :  { %2569 = vtanh.f32 %v646_v58 }
 0xbab   :  { %v2570_v23 = vpop.eup %2569 }
 0xbac   :  { %649 = vrot.lane.b32.xlu0 %v2570_v23, %s2937_s4 }
 0xc1e   :  { %v650_v24 = vpop.permute.xlu0 %649 }
 0xc1f   :  { %v3292_v27 = vmul.f32 %v2568_v17, %v650_v24 }
 0xc21   :  { %v653_v28 = vpack.c.bf16 %v3292_v27, %v3292_v27 }
 0xc23   :  { %655 = vrot.lane.b32.xlu1 %v653_v28, %s2938_s2  ;;  %v941_v28 = vld [vmem:[%s3659_s6] sm:$0xff] }
 0xc95   :  { %v656_v29 = vpop.permute.xlu1 %655 }
 0xc96   :  { %2359 = vmatmul.mubr.msk.bf16.vlgmr.msra.gmra.mrb[16].mxu0 %vm368_vm4, %v656_v29  ;;  %v942_v29 = vld [vmem:[%s3659_s6 + $0x8] sm:$0xff] }
 0xc97   :  { %2371 = vmatpush3.bf16.msra.mxu0 %v3186_v15  ;;  %2374 = vmatprep.mubr.msk.bf16.mxu0 %vm2935_vm2, %v2934_v16 }
 0xc98   :  { %2372 = vmatprep.subr.bf16.mxu0 %v2934_v16 }
 0xc9b   :  { %2373 = vmatpush3.bf16.msra.mxu0 %v3206_v25 }
 0xd69   :  { %v694_v30 = vpop.f32.mrb[16].mxu0 }
 0xd6a   :  { %v700_v31 = vadd.f32 %v694_v30, %v3236_v1  ;;  %v2360_v32 = vpop.f32.mrb[17].mxu0  ;;  %v954_v30 = vpack.c.bf16 %v942_v29, %v941_v28 }
 0xd6b   :  { %v697_v33 = vpop.f32.mrb[18].mxu0  ;;  %v950_v32 = vpack.c.bf16 %v3260_v42, %v3245_v20 }
 0xd6c   :  { %2571 = vtanh.f32 %v700_v31  ;;  %v2361_v34 = vpop.f32.mrb[19].mxu0  ;;  %v2161_v36 = vmul.f32 -1.442695, %v700_v31  ;;  %2386 = vmatprep.subr.bf16.mxu0 %v954_v30  ;;  %v943_v33 = vld [vmem:[%s3659_s6 + $0x10] sm:$0xff] }
 0xd6d   :  { %v944_v34 = vld [vmem:[%s3659_s6 + $0x18] sm:$0xff] }
 0xd6e   :  { %2573 = vpow2.f32 %v2161_v36 }
 0xd76   :  { %v2572_v35 = vpop.eup %2571 }
 0xd77   :  { %710 = vrot.lane.b32.xlu0 %v2572_v35, %s2937_s4  ;;  %v955_v35 = vpack.c.bf16 %v944_v34, %v943_v33 }
 0xd78   :  { %v2574_v37 = vpop.eup %2573 }
 0xd79   :  { %v704_v38 = vadd.f32 1.0, %v2574_v37 }
 0xd7b   :  { %2575 = vrcp.f32 %v704_v38  ;;  %v951_v38 = vpack.c.bf16 %v3292_v27, %v3276_v0  ;;  %v948_v0 = vld [vmem:[%s3660_s7 + $0x18] sm:$0xff] }
 0xd85   :  { %v2576_v39 = vpop.eup %2575 }
 0xd86   :  { %v708_v43 = vmul.f32 %v2576_v39, %v646_v58 }
 0xde9   :  { %v711_v40 = vpop.permute.xlu0 %710 }
 0xdea   :  { %v713_v41 = vmul.f32 %v2576_v39, %v711_v40  ;;  %v946_v40 = vld [vmem:[%s3660_s7 + $0x8] sm:$0xff] }
 0xdec   :  { %715 = vrot.lane.b32.xlu1 %v713_v41, %s2937_s4 }
 0xe5e   :  { %v716_v44 = vpop.permute.xlu1 %715 }
 0xe5f   :  { %v718_v1 = vadd.f32 %v716_v44, %v708_v43  ;;  %v947_v43 = vld [vmem:[%s3660_s7 + $0x10] sm:$0xff] }
 0xe60   :  { %v3377_v44 = vpack.c.bf16 %v948_v0, %v947_v43 }
 0xe61   :  { %2577 = vtanh.f32 %v718_v1 }
 0xe6b   :  { %v2578_v45 = vpop.eup %2577 }
 0xe6c   :  { %721 = vrot.lane.b32.xlu0 %v2578_v45, %s2937_s4 }
 0xede   :  { %v722_v46 = vpop.permute.xlu0 %721 }
 0xedf   :  { %v3307_v47 = vmul.f32 %v2576_v39, %v722_v46  ;;  %v945_v39 = vld [vmem:[%s3660_s7] sm:$0xff] }
 0xee0   :  { %v3367_v41 = vpack.c.bf16 %v946_v40, %v945_v39 }
 0xee1   :  { %v725_v48 = vpack.c.bf16 %v3307_v47, %v3307_v47 }
 0xee3   :  { %727 = vrot.lane.b32.xlu1 %v725_v48, %s2938_s2 }
 0xf55   :  { %v728_v49 = vpop.permute.xlu1 %727 }
 0xf56   :  { %2367 = vmatmul.mubr.msk.bf16.vlgmr.msra.gmra.mrb[16].mxu1 %vm368_vm4, %v728_v49 }
 0xf57   :  { %2379 = vmatpush3.bf16.msra.mxu1 %v3186_v15  ;;  %2382 = vmatprep.mubr.msk.bf16.mxu1 %vm2935_vm2, %v2934_v16 }
 0xf58   :  { %2380 = vmatprep.subr.bf16.mxu1 %v2934_v16 }
 0xf5b   :  { %2381 = vmatpush3.bf16.msra.mxu1 %v3206_v25 }
 0xf5c   :  { %2398 = vmatprep.subr.bf16.mxu1 %v2934_v16 }
0x1029   :  { %v766_v50 = vpop.f32.mrb[16].mxu1 }
0x102a   :  { %v772_v51 = vadd.f32 %v766_v50, %v3240_v5  ;;  %v2368_v52 = vpop.f32.mrb[17].mxu1  ;;  %v3397_v50 = vld [vmem:[#allocation10] ss:$0 sm:$0xff] }
0x102b   :  { %v769_v53 = vpop.f32.mrb[18].mxu1 }
0x102c   :  { %2579 = vtanh.f32 %v772_v51  ;;  %v2369_v55 = vpop.f32.mrb[19].mxu1  ;;  %v2163_v15 = vmul.f32 -1.442695, %v772_v51 }
0x102e   :  { %2581 = vpow2.f32 %v2163_v15 }
0x1036   :  { %v2580_v56 = vpop.eup %2579 }
0x1037   :  { %782 = vrot.lane.b32.xlu0 %v2580_v56, %s2937_s4 }
0x1038   :  { %v2582_v57 = vpop.eup %2581 }
0x1039   :  { %v776_v59 = vadd.f32 1.0, %v2582_v57 }
0x103b   :  { %2583 = vrcp.f32 %v776_v59 }
0x1045   :  { %v2584_v60 = vpop.eup %2583 }
0x1046   :  { %v780_v61 = vmul.f32 %v2584_v60, %v718_v1 }
0x10a9   :  { %v783_v54 = vpop.permute.xlu0 %782 }
0x10aa   :  { %v785_v25 = vmul.f32 %v2584_v60, %v783_v54 }
0x10ac   :  { %787 = vrot.lane.b32.xlu1 %v785_v25, %s2937_s4 }
0x111e   :  { %v788_v62 = vpop.permute.xlu1 %787 }
0x111f   :  { %v790_v5 = vadd.f32 %v788_v62, %v780_v61 }
0x1121   :  { %2585 = vtanh.f32 %v790_v5 }
0x112b   :  { %v2586_v2 = vpop.eup %2585 }
0x112c   :  { %793 = vrot.lane.b32.xlu0 %v2586_v2, %s2937_s4 }
0x119e   :  { %v794_v4 = vpop.permute.xlu0 %793 }
0x119f   :  { %v3323_v6 = vmul.f32 %v2584_v60, %v794_v4 }
0x11a1   :  { %v797_v7 = vpack.c.bf16 %v3323_v6, %v3323_v6 }
0x11a3   :  { %799 = vrot.lane.b32.xlu1 %v797_v7, %s2938_s2 }
0x1215   :  { %v800_v8 = vpop.permute.xlu1 %799 }
0x1216   :  { %2375 = vmatmul.mubr.msk.bf16.vlgmr.msra.gmra.mrb[20].mxu0 %vm368_vm4, %v800_v8 }
0x1217   :  { %2387 = vmatpush3.bf16.msra.mxu0 %v954_v30 }
0x1218   :  { %2388 = vmatprep.subr.bf16.mxu0 %v955_v35 }
0x121b   :  { %2389 = vmatpush3.bf16.msra.mxu0 %v955_v35 }
0x121c   :  { %2414 = vmatprep.subr.bf16.mxu0 %v2934_v16 }
0x12e9   :  { %v838_v9 = vpop.f32.mrb[20].mxu0 }
0x12ea   :  { %v844_v10 = vadd.f32 %v838_v9, %v3234_v63  ;;  %v2376_v11 = vpop.f32.mrb[21].mxu0 }
0x12eb   :  { %v841_v12 = vpop.f32.mrb[22].mxu0 }
0x12ec   :  { %2587 = vtanh.f32 %v844_v10  ;;  %v2377_v13 = vpop.f32.mrb[23].mxu0  ;;  %v2165_v17 = vmul.f32 -1.442695, %v844_v10 }
0x12ee   :  { %2589 = vpow2.f32 %v2165_v17 }
0x12f6   :  { %v2588_v14 = vpop.eup %2587 }
0x12f7   :  { %854 = vrot.lane.b32.xlu0 %v2588_v14, %s2937_s4 }
0x12f8   :  { %v2590_v18 = vpop.eup %2589 }
0x12f9   :  { %v848_v19 = vadd.f32 1.0, %v2590_v18 }
0x12fb   :  { %2591 = vrcp.f32 %v848_v19 }
0x1305   :  { %v2592_v21 = vpop.eup %2591 }
0x1306   :  { %v852_v23 = vmul.f32 %v2592_v21, %v790_v5 }
0x1369   :  { %v855_v22 = vpop.permute.xlu0 %854 }
0x136a   :  { %v857_v58 = vmul.f32 %v2592_v21, %v855_v22 }
0x136c   :  { %859 = vrot.lane.b32.xlu1 %v857_v58, %s2937_s4 }
0x13de   :  { %v860_v24 = vpop.permute.xlu1 %859 }
0x13df   :  { %v3332_v63 = vadd.f32 %v860_v24, %v852_v23 }
0x13e1   :  { %2593 = vtanh.f32 %v3332_v63 }
0x13eb   :  { %v2594_v31 = vpop.eup %2593 }
0x13ec   :  { %865 = vrot.lane.b32.xlu0 %v2594_v31, %s2937_s4 }
0x13f0   :  { %966 = vrot.lane.b32.xlu0 %v950_v32, %s2938_s2 }
0x145e   :  { %v866_v36 = vpop.permute.xlu0 %865 }
0x145f   :  { %v3352_v37 = vmul.f32 %v2592_v21, %v866_v36 }
0x1461   :  { %v869_v20 = vpack.c.bf16 %v3352_v37, %v3352_v37 }
0x1462   :  { %v967_v42 = vpop.permute.xlu0 %966 }
0x1463   :  { %871 = vrot.lane.b32.xlu1 %v869_v20, %s2938_s2  ;;  %2390 = vmatprep.mubr.msk.bf16.mxu0 %vm368_vm4, %v967_v42 }
0x1467   :  { %968 = vrot.lane.b32.xlu1 %v951_v38, %s2938_s2 }
0x14d5   :  { %v872_v27 = vpop.permute.xlu1 %871 }
0x14d6   :  { %2383 = vmatmul.mubr.msk.bf16.vlgmr.msra.gmra.mrb[20].mxu1 %vm368_vm4, %v872_v27 }
0x14d7   :  { %2399 = vmatpush3.bf16.msra.mxu1 %v3367_v41  ;;  %2402 = vmatprep.mubr.msk.bf16.mxu1 %vm2935_vm2, %v2934_v16 }
0x14d8   :  { %2400 = vmatprep.subr.bf16.mxu1 %v2934_v16 }
0x14d9   :  { %v969_v1 = vpop.permute.xlu1 %968 }
0x14da   :  { %2391 = vmatmul.mubr.msk.bf16.vlgmr.msra.gmra.mrb[24].mxu0 %vm368_vm4, %v969_v1 }
0x14db   :  { %2401 = vmatpush3.bf16.msra.mxu1 %v3377_v44  ;;  %2415 = vmatpush3.bf16.msra.mxu0 %v3367_v41 }
0x14dc   :  { %2406 = vmatprep.subr.bf16.mxu1 %v2934_v16  ;;  %2416 = vmatprep.subr.bf16.mxu0 %v2934_v16 }
0x14de   :  { %2403 = vmatmul.mubr.bf16.vlgmr.msra.gmra.mrb[24].mxu1 %v2936_v26 }
0x14df   :  { %2407 = vmatpush3.bf16.msra.mxu1 %v3367_v41  ;;  %2410 = vmatprep.mubr.msk.bf16.mxu1 %vm2935_vm2, %v2934_v16 }
0x14e0   :  { %2408 = vmatprep.subr.bf16.mxu1 %v2934_v16  ;;  %2417 = vmatpush3.bf16.msra.mxu0 %v3377_v44 }
0x14e1   :  { %2430 = vmatprep.subr.bf16.mxu0 %v2934_v16 }
0x14e3   :  { %2409 = vmatpush3.bf16.msra.mxu1 %v3377_v44 }
0x14e4   :  { %2422 = vmatprep.subr.bf16.mxu1 %v2934_v16 }
0x15a9   :  { %v910_v45 = vpop.f32.mrb[20].mxu1 }
0x15aa   :  { %v916_v46 = vadd.f32 %v910_v45, %v3238_v3  ;;  %v2384_v48 = vpop.f32.mrb[21].mxu1 }
0x15ab   :  { %v913_v26 = vpop.f32.mrb[22].mxu1 }
0x15ac   :  { %v2385_v49 = vpop.f32.mrb[23].mxu1  ;;  %v2167_v12 = vmul.f32 -1.442695, %v916_v46 }
0x15ad   :  { %v3399_v51 = vpop.f32.mrb[24].mxu0 }
0x15ae   :  { %v1020_v52 = vpop.f32.mrb[25].mxu0 }
0x15af   :  { %v1021_v53 = vadd.f32 %v3397_v50, %v1020_v52  ;;  %v3402_v55 = vpop.f32.mrb[26].mxu0 }
0x15b0   :  { %v1023_v56 = vpop.f32.mrb[27].mxu0 }
0x15b1   :  { %v1087_v15 = vpop.f32.mrb[24].mxu1  ;;  %v1024_v33 = vadd.f32 %v3397_v50, %v1023_v56 }
0x15b2   :  { %v1093_v57 = vadd.f32 %v1087_v15, %v1021_v53  ;;  %v2404_v59 = vpop.f32.mrb[25].mxu1 }
0x15b3   :  { %v1090_v60 = vpop.f32.mrb[26].mxu1 }
0x15b4   :  { %2595 = vtanh.f32 %v1093_v57  ;;  %v2405_v54 = vpop.f32.mrb[27].mxu1  ;;  %v2173_v25 = vmul.f32 -1.442695, %v1093_v57 }
0x15b5   :  { %v1029_v54 = vadd.f32 %v3399_v51, %v3397_v50 }
0x15b6   :  { %2597 = vpow2.f32 %v2173_v25 }
0x15be   :  { %v2596_v3 = vpop.eup %2595 }
0x15bf   :  { %1103 = vrot.lane.b32.xlu0 %v2596_v3, %s2937_s4 }
0x15c0   :  { %v2598_v61 = vpop.eup %2597 }
0x15c1   :  { %v1097_v62 = vadd.f32 1.0, %v2598_v61 }
0x15c3   :  { %2599 = vrcp.f32 %v1097_v62 }
0x15cd   :  { %v2600_v5 = vpop.eup %2599 }
0x15ce   :  { %v1101_v7 = vmul.f32 0.0, %v2600_v5 }
0x1631   :  { %v1104_v2 = vpop.permute.xlu0 %1103 }
0x1632   :  { %v1106_v4 = vmul.f32 %v2600_v5, %v1104_v2 }
0x1634   :  { %1108 = vrot.lane.b32.xlu1 %v1106_v4, %s2937_s4 }
0x16a6   :  { %v1109_v8 = vpop.permute.xlu1 %1108 }
0x16a7   :  { %v1111_v9 = vadd.f32 %v1109_v8, %v1101_v7 }
0x16a9   :  { %2601 = vtanh.f32 %v1111_v9 }
0x16aa   :  { %2603 = vtanh.f32 %v916_v46 }
0x16ab   :  { %2605 = vpow2.f32 %v2167_v12 }
0x16b3   :  { %v2602_v10 = vpop.eup %2601 }
0x16b4   :  { %1114 = vrot.lane.b32.xlu0 %v2602_v10, %s2937_s4  ;;  %v2604_v11 = vpop.eup %2603 }
0x16b5   :  { %v2606_v13 = vpop.eup %2605 }
0x16b6   :  { %v920_v14 = vadd.f32 1.0, %v2606_v13 }
0x16b8   :  { %926 = vrot.lane.b32.xlu0 %v2604_v11, %s2937_s4  ;;  %2607 = vrcp.f32 %v920_v14 }
0x16c2   :  { %v2608_v21 = vpop.eup %2607 }
0x16c3   :  { %v924_v24 = vmul.f32 %v2608_v21, %v3332_v63  ;;  %v952_v63 = vpack.c.bf16 %v3323_v6, %v3307_v47 }
0x1726   :  { %v1115_v17 = vpop.permute.xlu0 %1114 }
0x1727   :  { %v3408_v18 = vmul.f32 %v2600_v5, %v1115_v17 }
0x1729   :  { %v1118_v19 = vpack.c.bf16 %v3408_v18, %v3408_v18 }
0x172a   :  { %v927_v22 = vpop.permute.xlu0 %926 }
0x172b   :  { %v929_v58 = vmul.f32 %v2608_v21, %v927_v22  ;;  %1120 = vrot.lane.b32.xlu1 %v1118_v19, %s2938_s2 }
0x172d   :  { %931 = vrot.lane.b32.xlu0 %v929_v58, %s2937_s4  ;;  %v1032_v58 = vadd.f32 %v3402_v55, %v3397_v50 }
0x179d   :  { %v1121_v23 = vpop.permute.xlu1 %1120 }
0x179e   :  { %2411 = vmatmul.mubr.msk.bf16.vlgmr.msra.gmra.mrb[28].mxu1 %vm368_vm4, %v1121_v23 }
0x179f   :  { %v932_v28 = vpop.permute.xlu0 %931  ;;  %2423 = vmatpush3.bf16.msra.mxu1 %v3367_v41  ;;  %2426 = vmatprep.mubr.msk.bf16.mxu1 %vm2935_vm2, %v2934_v16 }
0x17a0   :  { %v934_v29 = vadd.f32 %v932_v28, %v924_v24  ;;  %2424 = vmatprep.subr.bf16.mxu1 %v2934_v16 }
0x17a2   :  { %2609 = vtanh.f32 %v934_v29 }
0x17a3   :  { %2425 = vmatpush3.bf16.msra.mxu1 %v3377_v44 }
0x17a4   :  { %2438 = vmatprep.subr.bf16.mxu1 %v2934_v16 }
0x17ac   :  { %v2610_v30 = vpop.eup %2609 }
0x17ad   :  { %937 = vrot.lane.b32.xlu0 %v2610_v30, %s2937_s4 }
0x17b1   :  { %970 = vrot.lane.b32.xlu0 %v952_v63, %s2938_s2 }
0x181f   :  { %v938_v31 = vpop.permute.xlu0 %937 }
0x1820   :  { %v940_v46 = vmul.f32 %v2608_v21, %v938_v31 }
0x1822   :  { %v953_v26 = vpack.c.bf16 %v940_v46, %v3352_v37 }
0x1823   :  { %v971_v32 = vpop.permute.xlu0 %970 }
0x1824   :  { %2394 = vmatprep.mubr.msk.bf16.mxu0 %vm368_vm4, %v971_v32 }
0x1871   :  { %v1159_v34 = vpop.f32.mrb[28].mxu1 }
0x1872   :  { %v1165_v35 = vadd.f32 %v1159_v34, %v1024_v33  ;;  %v2412_v36 = vpop.f32.mrb[29].mxu1 }
0x1873   :  { %v1162_v20 = vpop.f32.mrb[30].mxu1 }
0x1874   :  { %2611 = vtanh.f32 %v1165_v35  ;;  %v2413_v42 = vpop.f32.mrb[31].mxu1  ;;  %v2175_v39 = vmul.f32 -1.442695, %v1165_v35 }
0x1876   :  { %2613 = vpow2.f32 %v2175_v39 }
0x187e   :  { %v2612_v38 = vpop.eup %2611 }
0x187f   :  { %1175 = vrot.lane.b32.xlu1 %v2612_v38, %s2937_s4 }
0x1880   :  { %v2614_v47 = vpop.eup %2613 }
0x1881   :  { %v1169_v6 = vadd.f32 1.0, %v2614_v47 }
0x1883   :  { %2615 = vrcp.f32 %v1169_v6 }
0x188d   :  { %v2616_v40 = vpop.eup %2615 }
0x188e   :  { %v1173_v27 = vmul.f32 %v2616_v40, %v1111_v9 }
0x18f1   :  { %v1176_v43 = vpop.permute.xlu1 %1175 }
0x18f2   :  { %v1178_v0 = vmul.f32 %v2616_v40, %v1176_v43 }
0x18f4   :  { %1180 = vrot.lane.b32.xlu1 %v1178_v0, %s2937_s4 }
0x1966   :  { %v1181_v1 = vpop.permute.xlu1 %1180 }
0x1967   :  { %v1183_v45 = vadd.f32 %v1181_v1, %v1173_v27 }
0x1969   :  { %2617 = vtanh.f32 %v1183_v45 }
0x1973   :  { %v2618_v48 = vpop.eup %2617 }
0x1974   :  { %1186 = vrot.lane.b32.xlu1 %v2618_v48, %s2937_s4 }
0x1978   :  { %972 = vrot.lane.b32.xlu1 %v953_v26, %s2938_s2 }
0x19e6   :  { %v1187_v49 = vpop.permute.xlu1 %1186 }
0x19e7   :  { %v3433_v52 = vmul.f32 %v2616_v40, %v1187_v49 }
0x19e9   :  { %v1190_v53 = vpack.c.bf16 %v3433_v52, %v3433_v52 }
0x19ea   :  { %v973_v56 = vpop.permute.xlu1 %972 }
0x19eb   :  { %1192 = vrot.lane.b32.xlu0 %v1190_v53, %s2938_s2  ;;  %2395 = vmatmul.mubr.msk.bf16.gmra.mrb[28].mxu0 %vm368_vm4, %v973_v56 }
0x19ec   :  { %2418 = vmatprep.mubr.msk.bf16.mxu0 %vm2935_vm2, %v2934_v16 }
0x1a5d   :  { %v1193_v15 = vpop.permute.xlu0 %1192 }
0x1a5e   :  { %2419 = vmatmul.mubr.msk.bf16.vlgmr.msra.gmra.mrb[32].mxu0 %vm368_vm4, %v1193_v15 }
0x1a5f   :  { %2431 = vmatpush3.bf16.msra.mxu0 %v3367_v41  ;;  %2434 = vmatprep.mubr.msk.bf16.mxu0 %vm2935_vm2, %v2934_v16 }
0x1a60   :  { %2432 = vmatprep.subr.bf16.mxu0 %v2934_v16 }
0x1a63   :  { %2433 = vmatpush3.bf16.msra.mxu0 %v3377_v44 }
0x1a64   :  { %2446 = vmatprep.subr.bf16.mxu0 %v2934_v16 }
0x1abe   :  { %v3448_v37 = vpop.f32.mrb[28].mxu0 }
0x1abf   :  { %v3450_v57 = vpop.f32.mrb[29].mxu0 }
0x1ac0   :  { %v3452_v59 = vpop.f32.mrb[30].mxu0  ;;  %v1037_v43 = vadd.f32 %v3397_v50, %v3450_v57 }
0x1ac1   :  { %v3454_v60 = vpop.f32.mrb[31].mxu0 }
0x1b31   :  { %v1231_v3 = vpop.f32.mrb[32].mxu0 }
0x1b32   :  { %v1237_v25 = vadd.f32 %v1231_v3, %v1029_v54  ;;  %v2420_v61 = vpop.f32.mrb[33].mxu0 }
0x1b33   :  { %v1234_v62 = vpop.f32.mrb[34].mxu0 }
0x1b34   :  { %2619 = vtanh.f32 %v1237_v25  ;;  %v2421_v5 = vpop.f32.mrb[35].mxu0  ;;  %v2177_v4 = vmul.f32 -1.442695, %v1237_v25 }
0x1b36   :  { %2621 = vpow2.f32 %v2177_v4 }
0x1b3e   :  { %v2620_v2 = vpop.eup %2619 }
0x1b3f   :  { %1247 = vrot.lane.b32.xlu1 %v2620_v2, %s2937_s4 }
0x1b40   :  { %v2622_v7 = vpop.eup %2621 }
0x1b41   :  { %v1241_v8 = vadd.f32 1.0, %v2622_v7  ;;  %v1040_v7 = vadd.f32 %v3397_v50, %v3454_v60 }
0x1b43   :  { %2623 = vrcp.f32 %v1241_v8 }
0x1b4d   :  { %v2624_v9 = vpop.eup %2623 }
0x1b4e   :  { %v1245_v51 = vmul.f32 %v2624_v9, %v1183_v45 }
0x1bb1   :  { %v1248_v10 = vpop.permute.xlu1 %1247 }
0x1bb2   :  { %v1250_v11 = vmul.f32 %v2624_v9, %v1248_v10 }
0x1bb4   :  { %1252 = vrot.lane.b32.xlu0 %v1250_v11, %s2937_s4 }
0x1c26   :  { %v1253_v12 = vpop.permute.xlu0 %1252 }
0x1c27   :  { %v1255_v13 = vadd.f32 %v1253_v12, %v1245_v51 }
0x1c29   :  { %2625 = vtanh.f32 %v1255_v13 }
0x1c33   :  { %v2626_v14 = vpop.eup %2625 }
0x1c34   :  { %1258 = vrot.lane.b32.xlu1 %v2626_v14, %s2937_s4 }
0x1ca6   :  { %v1259_v17 = vpop.permute.xlu1 %1258 }
0x1ca7   :  { %v3461_v19 = vmul.f32 %v2624_v9, %v1259_v17 }
0x1ca9   :  { %v1262_v21 = vpack.c.bf16 %v3461_v19, %v3461_v19 }
0x1cab   :  { %1264 = vrot.lane.b32.xlu0 %v1262_v21, %s2938_s2 }
0x1d1d   :  { %v1265_v22 = vpop.permute.xlu0 %1264 }
0x1d1e   :  { %2427 = vmatmul.mubr.msk.bf16.vlgmr.msra.gmra.mrb[32].mxu1 %vm368_vm4, %v1265_v22 }
0x1d1f   :  { %2439 = vmatpush3.bf16.msra.mxu1 %v3367_v41  ;;  %2442 = vmatprep.mubr.msk.bf16.mxu1 %vm2935_vm2, %v2934_v16 }
0x1d20   :  { %2440 = vmatprep.subr.bf16.mxu1 %v2934_v16 }
0x1d23   :  { %2441 = vmatpush3.bf16.msra.mxu1 %v3377_v44 }
0x1d24   :  { %2454 = vmatprep.subr.bf16.mxu1 %v2934_v16 }
0x1df1   :  { %v1303_v23 = vpop.f32.mrb[32].mxu1 }
0x1df2   :  { %v1309_v24 = vadd.f32 %v1303_v23, %v1032_v58  ;;  %v2428_v28 = vpop.f32.mrb[33].mxu1 }
0x1df3   :  { %v1306_v29 = vpop.f32.mrb[34].mxu1 }
0x1df4   :  { %2627 = vtanh.f32 %v1309_v24  ;;  %v2429_v30 = vpop.f32.mrb[35].mxu1  ;;  %v2179_v31 = vmul.f32 -1.442695, %v1309_v24 }
0x1df5   :  { %v1045_v30 = vadd.f32 %v3448_v37, %v3397_v50 }
0x1df6   :  { %2629 = vpow2.f32 %v2179_v31 }
0x1dfe   :  { %v2628_v63 = vpop.eup %2627 }
0x1dff   :  { %1319 = vrot.lane.b32.xlu1 %v2628_v63, %s2937_s4 }
0x1e00   :  { %v2630_v32 = vpop.eup %2629 }
0x1e01   :  { %v1313_v33 = vadd.f32 1.0, %v2630_v32 }
0x1e03   :  { %2631 = vrcp.f32 %v1313_v33 }
0x1e0d   :  { %v2632_v34 = vpop.eup %2631 }
0x1e0e   :  { %v1317_v55 = vmul.f32 %v2632_v34, %v1255_v13 }
0x1e71   :  { %v1320_v35 = vpop.permute.xlu1 %1319 }
0x1e72   :  { %v1322_v36 = vmul.f32 %v2632_v34, %v1320_v35 }
0x1e74   :  { %1324 = vrot.lane.b32.xlu0 %v1322_v36, %s2937_s4 }
0x1ee6   :  { %v1325_v20 = vpop.permute.xlu0 %1324 }
0x1ee7   :  { %v1327_v42 = vadd.f32 %v1325_v20, %v1317_v55 }
0x1ee9   :  { %2633 = vtanh.f32 %v1327_v42 }
0x1ef3   :  { %v2634_v38 = vpop.eup %2633 }
0x1ef4   :  { %1330 = vrot.lane.b32.xlu1 %v2634_v38, %s2937_s4 }
0x1f66   :  { %v1331_v39 = vpop.permute.xlu1 %1330 }
0x1f67   :  { %v3478_v47 = vmul.f32 %v2632_v34, %v1331_v39 }
0x1f69   :  { %v1334_v6 = vpack.c.bf16 %v3478_v47, %v3478_v47 }
0x1f6b   :  { %1336 = vrot.lane.b32.xlu0 %v1334_v6, %s2938_s2 }
0x1fdd   :  { %v1337_v40 = vpop.permute.xlu0 %1336 }
0x1fde   :  { %2435 = vmatmul.mubr.msk.bf16.vlgmr.msra.gmra.mrb[36].mxu0 %vm368_vm4, %v1337_v40 }
0x1fdf   :  { %2447 = vmatpush3.bf16.msra.mxu0 %v3367_v41  ;;  %2450 = vmatprep.mubr.msk.bf16.mxu0 %vm2935_vm2, %v2934_v16 }
0x1fe0   :  { %2448 = vmatprep.subr.bf16.mxu0 %v2934_v16 }
0x1fe3   :  { %2449 = vmatpush3.bf16.msra.mxu0 %v3377_v44 }
0x20b1   :  { %v1375_v0 = vpop.f32.mrb[36].mxu0 }
0x20b2   :  { %v1381_v27 = vadd.f32 %v1375_v0, %v1037_v43  ;;  %v2436_v1 = vpop.f32.mrb[37].mxu0 }
0x20b3   :  { %v1378_v45 = vpop.f32.mrb[38].mxu0 }
0x20b4   :  { %2635 = vtanh.f32 %v1381_v27  ;;  %v2437_v46 = vpop.f32.mrb[39].mxu0  ;;  %v2181_v26 = vmul.f32 -1.442695, %v1381_v27 }
0x20b5   :  { %v1048_v46 = vadd.f32 %v3452_v59, %v3397_v50  ;;  %v1626_v50 = vpack.c.bf16 %v3433_v52, %v3408_v18  ;;  %v1622_v59 = vld [vmem:[#allocation11] sm:$0xff] }
0x20b6   :  { %2637 = vpow2.f32 %v2181_v26 }
0x20be   :  { %v2636_v48 = vpop.eup %2635 }
0x20bf   :  { %1391 = vrot.lane.b32.xlu1 %v2636_v48, %s2937_s4 }
0x20c0   :  { %v2638_v49 = vpop.eup %2637 }
0x20c1   :  { %v1385_v53 = vadd.f32 1.0, %v2638_v49 }
0x20c3   :  { %2639 = vrcp.f32 %v1385_v53 }
0x20cd   :  { %v2640_v56 = vpop.eup %2639 }
0x20ce   :  { %v1389_v57 = vmul.f32 %v2640_v56, %v1327_v42 }
0x2131   :  { %v1392_v15 = vpop.permute.xlu1 %1391 }
0x2132   :  { %v1394_v54 = vmul.f32 %v2640_v56, %v1392_v15 }
0x2134   :  { %1396 = vrot.lane.b32.xlu0 %v1394_v54, %s2937_s4 }
0x21a6   :  { %v1397_v3 = vpop.permute.xlu0 %1396 }
0x21a7   :  { %v1399_v25 = vadd.f32 %v1397_v3, %v1389_v57 }
0x21a9   :  { %2641 = vtanh.f32 %v1399_v25 }
0x21b3   :  { %v2642_v61 = vpop.eup %2641 }
0x21b4   :  { %1402 = vrot.lane.b32.xlu1 %v2642_v61, %s2937_s4 }
0x2226   :  { %v1403_v62 = vpop.permute.xlu1 %1402 }
0x2227   :  { %v3494_v5 = vmul.f32 %v2640_v56, %v1403_v62 }
0x2229   :  { %v1406_v2 = vpack.c.bf16 %v3494_v5, %v3494_v5 }
0x222b   :  { %1408 = vrot.lane.b32.xlu0 %v1406_v2, %s2938_s2  ;;  %v1623_v2 = vld [vmem:[#allocation11 + $0x8] sm:$0xff] }
0x229d   :  { %v1409_v4 = vpop.permute.xlu0 %1408 }
0x229e   :  { %2443 = vmatmul.mubr.msk.bf16.vlgmr.msra.gmra.mrb[36].mxu1 %vm368_vm4, %v1409_v4  ;;  %v1630_v4 = vpack.c.bf16 %v1623_v2, %v1622_v59 }
0x229f   :  { %2455 = vmatpush3.bf16.msra.mxu1 %v3367_v41  ;;  %2458 = vmatprep.mubr.msk.bf16.mxu1 %vm2935_vm2, %v2934_v16 }
0x22a0   :  { %2456 = vmatprep.subr.bf16.mxu1 %v2934_v16  ;;  %2462 = vmatprep.subr.bf16.mxu0 %v1630_v4 }
0x22a3   :  { %2457 = vmatpush3.bf16.msra.mxu1 %v3377_v44 }
0x2371   :  { %v1447_v8 = vpop.f32.mrb[36].mxu1 }
0x2372   :  { %v1453_v9 = vadd.f32 %v1447_v8, %v1040_v7  ;;  %v2444_v10 = vpop.f32.mrb[37].mxu1  ;;  %v1624_v8 = vld [vmem:[#allocation11 + $0x10] sm:$0xff] }
0x2373   :  { %v1450_v11 = vpop.f32.mrb[38].mxu1 }
0x2374   :  { %2643 = vtanh.f32 %v1453_v9  ;;  %v2445_v51 = vpop.f32.mrb[39].mxu1  ;;  %v2183_v41 = vmul.f32 -1.442695, %v1453_v9  ;;  %v1625_v9 = vld [vmem:[#allocation11 + $0x18] sm:$0xff] }
0x2375   :  { %v1631_v11 = vpack.c.bf16 %v1625_v9, %v1624_v8 }
0x2376   :  { %2645 = vpow2.f32 %v2183_v41 }
0x237e   :  { %v2644_v12 = vpop.eup %2643 }
0x237f   :  { %1463 = vrot.lane.b32.xlu1 %v2644_v12, %s2937_s4 }
0x2380   :  { %v2646_v13 = vpop.eup %2645 }
0x2381   :  { %v1457_v14 = vadd.f32 1.0, %v2646_v13 }
0x2383   :  { %2647 = vrcp.f32 %v1457_v14 }
0x238d   :  { %v2648_v16 = vpop.eup %2647 }
0x238e   :  { %v1461_v60 = vmul.f32 %v2648_v16, %v1399_v25 }
0x23f1   :  { %v1464_v17 = vpop.permute.xlu1 %1463 }
0x23f2   :  { %v1466_v44 = vmul.f32 %v2648_v16, %v1464_v17 }
0x23f4   :  { %1468 = vrot.lane.b32.xlu0 %v1466_v44, %s2937_s4  ;;  %v1760_v44 = vld [vmem:[%s3664_s11] sm:$0xff] }
0x2466   :  { %v1469_v21 = vpop.permute.xlu0 %1468 }
0x2467   :  { %v1471_v22 = vadd.f32 %v1469_v21, %v1461_v60  ;;  %v1762_v60 = vld [vmem:[%s3664_s11 + $0x10] sm:$0xff]  ;;  %v1763_v21 = vld [vmem:[%s3664_s11 + $0x18] sm:$0xff] }
0x2469   :  { %2649 = vtanh.f32 %v1471_v22 }
0x2473   :  { %v2650_v58 = vpop.eup %2649 }
0x2474   :  { %1474 = vrot.lane.b32.xlu1 %v2650_v58, %s2937_s4  ;;  %v1764_v58 = vld [vmem:[%s3664_s11 + $0x20] sm:$0xff] }
0x24e6   :  { %v1475_v23 = vpop.permute.xlu1 %1474 }
0x24e7   :  { %v1477_v24 = vmul.f32 %v2648_v16, %v1475_v23  ;;  %v1765_v23 = vld [vmem:[%s3664_s11 + $0x28] sm:$0xff] }
0x24e9   :  { %v1478_v28 = vpack.c.bf16 %v1477_v24, %v1477_v24  ;;  %v1628_v7 = vpack.c.bf16 %v1477_v24, %v3494_v5  ;;  %v1627_v5 = vpack.c.bf16 %v3478_v47, %v3461_v19  ;;  %v1761_v19 = vld [vmem:[%s3664_s11 + $0x8] sm:$0xff]  ;;  %v1774_v24 = vpack.c.bf16 %v1765_v23, %v1764_v58 }
0x24ea   :  { %v1772_v47 = vpack.c.bf16 %v1761_v19, %v1760_v44  ;;  %v1899_v19 = vld [vmem:[%s3666_s13 + $0x30] sm:$0xff] }
0x24eb   :  { %1480 = vrot.lane.b32.xlu0 %v1478_v28, %s2938_s2  ;;  %v1766_v28 = vld [vmem:[%s3664_s11 + $0x30] sm:$0xff] }
0x24ec   :  { %2474 = vmatprep.subr.bf16.mxu1 %v1772_v47 }
0x255d   :  { %v1481_v29 = vpop.permute.xlu0 %1480 }
0x255e   :  { %2451 = vmatmul.mubr.msk.bf16.vlgmr.msra.gmra.mrb[40].mxu0 %vm368_vm4, %v1481_v29  ;;  %v1767_v29 = vld [vmem:[%s3664_s11 + $0x38] sm:$0xff] }
0x255f   :  { %2463 = vmatpush3.bf16.msra.mxu0 %v1630_v4 }
0x2560   :  { %2464 = vmatprep.subr.bf16.mxu0 %v1631_v11 }
0x2563   :  { %2465 = vmatpush3.bf16.msra.mxu0 %v1631_v11 }
0x2631   :  { %v1519_v63 = vpop.f32.mrb[40].mxu0 }
0x2632   :  { %v1525_v31 = vadd.f32 %v1519_v63, %v1045_v30  ;;  %v2452_v32 = vpop.f32.mrb[41].mxu0  ;;  %v1775_v30 = vpack.c.bf16 %v1767_v29, %v1766_v28 }
0x2633   :  { %v1522_v33 = vpop.f32.mrb[42].mxu0 }
0x2634   :  { %2651 = vtanh.f32 %v1525_v31  ;;  %v2453_v34 = vpop.f32.mrb[43].mxu0  ;;  %v2185_v36 = vmul.f32 -1.442695, %v1525_v31  ;;  %v2188_v31 = vld [vmem:[#allocation13] ss:$0 sm:$0xff] }
0x2636   :  { %2653 = vpow2.f32 %v2185_v36 }
0x263e   :  { %v2652_v35 = vpop.eup %2651 }
0x263f   :  { %1535 = vrot.lane.b32.xlu1 %v2652_v35, %s2937_s4 }
0x2640   :  { %v2654_v55 = vpop.eup %2653 }
0x2641   :  { %v1529_v20 = vadd.f32 1.0, %v2654_v55 }
0x2643   :  { %2655 = vrcp.f32 %v1529_v20 }
0x264d   :  { %v2656_v42 = vpop.eup %2655 }
0x264e   :  { %v1533_v37 = vmul.f32 %v2656_v42, %v1471_v22  ;;  %v1773_v22 = vpack.c.bf16 %v1763_v21, %v1762_v60 }
0x26b1   :  { %v1536_v38 = vpop.permute.xlu1 %1535 }
0x26b2   :  { %v1538_v39 = vmul.f32 %v2656_v42, %v1536_v38 }
0x26b4   :  { %1540 = vrot.lane.b32.xlu0 %v1538_v39, %s2937_s4 }
0x2726   :  { %v1541_v6 = vpop.permute.xlu0 %1540 }
0x2727   :  { %v1543_v40 = vadd.f32 %v1541_v6, %v1533_v37 }
0x2729   :  { %2657 = vtanh.f32 %v1543_v40 }
0x2733   :  { %v2658_v43 = vpop.eup %2657 }
0x2734   :  { %1546 = vrot.lane.b32.xlu1 %v2658_v43, %s2937_s4 }
0x27a6   :  { %v1547_v0 = vpop.permute.xlu1 %1546 }
0x27a7   :  { %v1549_v27 = vmul.f32 %v2656_v42, %v1547_v0 }
0x27a9   :  { %v1550_v1 = vpack.c.bf16 %v1549_v27, %v1549_v27 }
0x27ab   :  { %1552 = vrot.lane.b32.xlu0 %v1550_v1, %s2938_s2 }
0x281d   :  { %v1553_v45 = vpop.permute.xlu0 %1552 }
0x281e   :  { %2459 = vmatmul.mubr.msk.bf16.vlgmr.msra.gmra.mrb[40].mxu1 %vm368_vm4, %v1553_v45 }
0x281f   :  { %2475 = vmatpush3.bf16.msra.mxu1 %v1772_v47  ;;  %v1900_v47 = vld [vmem:[%s3666_s13 + $0x38] sm:$0xff] }
0x2820   :  { %2476 = vmatprep.subr.bf16.mxu1 %v1773_v22  ;;  %v1908_v60 = vpack.c.bf16 %v1900_v47, %v1899_v19  ;;  %v2031_v47 = vld [vmem:[%s3668_s15 + $0x30] sm:$0xff] }
0x2823   :  { %2477 = vmatpush3.bf16.msra.mxu1 %v1773_v22 }
0x2824   :  { %2478 = vmatprep.subr.bf16.mxu1 %v1774_v24 }
0x2827   :  { %2479 = vmatpush3.bf16.msra.mxu1 %v1774_v24 }
0x2828   :  { %2480 = vmatprep.subr.bf16.mxu1 %v1775_v30 }
0x282b   :  { %2481 = vmatpush3.bf16.msra.mxu1 %v1775_v30 }
0x28f1   :  { %v1591_v48 = vpop.f32.mrb[40].mxu1 }
0x28f2   :  { %v1597_v26 = vadd.f32 %v1591_v48, %v1048_v46  ;;  %v2460_v49 = vpop.f32.mrb[41].mxu1 }
0x28f3   :  { %v1594_v53 = vpop.f32.mrb[42].mxu1 }
0x28f4   :  { %2659 = vtanh.f32 %v1597_v26  ;;  %v2461_v56 = vpop.f32.mrb[43].mxu1  ;;  %v2187_v54 = vmul.f32 -1.442695, %v1597_v26 }
0x28f6   :  { %2661 = vpow2.f32 %v2187_v54 }
0x28fe   :  { %v2660_v15 = vpop.eup %2659 }
0x28ff   :  { %1607 = vrot.lane.b32.xlu1 %v2660_v15, %s2937_s4 }
0x2900   :  { %v2662_v57 = vpop.eup %2661 }
0x2901   :  { %v1601_v3 = vadd.f32 1.0, %v2662_v57 }
0x2903   :  { %2663 = vrcp.f32 %v1601_v3 }
0x290d   :  { %v2664_v25 = vpop.eup %2663 }
0x290e   :  { %v1605_v10 = vmul.f32 %v2664_v25, %v1543_v40 }
0x2971   :  { %v1608_v61 = vpop.permute.xlu1 %1607 }
0x2972   :  { %v1610_v62 = vmul.f32 %v2664_v25, %v1608_v61  ;;  %v1893_v61 = vld [vmem:[%s3666_s13] sm:$0xff] }
0x2974   :  { %1612 = vrot.lane.b32.xlu0 %v1610_v62, %s2937_s4  ;;  %v1894_v62 = vld [vmem:[%s3666_s13 + $0x8] sm:$0xff] }
0x2975   :  { %v1905_v2 = vpack.c.bf16 %v1894_v62, %v1893_v61  ;;  %v2025_v62 = vld [vmem:[%s3668_s15] sm:$0xff] }
0x2977   :  { %2490 = vmatprep.subr.bf16.mxu0 %v1905_v2 }
0x2978   :  { %1643 = vrot.lane.b32.xlu0 %v1626_v50, %s2938_s2 }
0x297c   :  { %1647 = vrot.lane.b32.xlu0 %v1628_v7, %s2938_s2 }
0x29e6   :  { %v1613_v51 = vpop.permute.xlu0 %1612 }
0x29e7   :  { %v1615_v12 = vadd.f32 %v1613_v51, %v1605_v10 }
0x29e9   :  { %2665 = vtanh.f32 %v1615_v12  ;;  %v1895_v12 = vld [vmem:[%s3666_s13 + $0x10] sm:$0xff] }
0x29ea   :  { %v1644_v18 = vpop.permute.xlu0 %1643 }
0x29eb   :  { %2466 = vmatprep.mubr.msk.bf16.mxu0 %vm368_vm4, %v1644_v18  ;;  %v1896_v18 = vld [vmem:[%s3666_s13 + $0x18] sm:$0xff] }
0x29ee   :  { %v1648_v17 = vpop.permute.xlu0 %1647 }
0x29f3   :  { %v2666_v52 = vpop.eup %2665 }
0x29f4   :  { %1618 = vrot.lane.b32.xlu1 %v2666_v52, %s2937_s4 }
0x29f8   :  { %1645 = vrot.lane.b32.xlu1 %v1627_v5, %s2938_s2 }
0x2a66   :  { %v1619_v41 = vpop.permute.xlu1 %1618 }
0x2a67   :  { %v1621_v13 = vmul.f32 %v2664_v25, %v1619_v41  ;;  %v1906_v41 = vpack.c.bf16 %v1896_v18, %v1895_v12  ;;  %v2027_v18 = vld [vmem:[%s3668_s15 + $0x10] sm:$0xff] }
0x2a69   :  { %v1629_v14 = vpack.c.bf16 %v1621_v13, %v1549_v27 }
0x2a6a   :  { %v1646_v16 = vpop.permute.xlu1 %1645 }
0x2a6b   :  { %1649 = vrot.lane.b32.xlu1 %v1629_v14, %s2938_s2  ;;  %2467 = vmatmul.mubr.msk.bf16.vlgmr.msra.gmra.mrb[44].mxu0 %vm368_vm4, %v1646_v16  ;;  %v1897_v16 = vld [vmem:[%s3666_s13 + $0x20] sm:$0xff] }
0x2a6c   :  { %2470 = vmatprep.mubr.msk.bf16.mxu0 %vm368_vm4, %v1648_v17  ;;  %2491 = vmatpush3.bf16.msra.mxu0 %v1905_v2  ;;  %v1898_v17 = vld [vmem:[%s3666_s13 + $0x28] sm:$0xff] }
0x2a6d   :  { %2492 = vmatprep.subr.bf16.mxu0 %v1906_v41  ;;  %v1907_v44 = vpack.c.bf16 %v1898_v17, %v1897_v16  ;;  %v2029_v17 = vld [vmem:[%s3668_s15 + $0x20] sm:$0xff] }
0x2a70   :  { %2493 = vmatpush3.bf16.msra.mxu0 %v1906_v41 }
0x2a71   :  { %2494 = vmatprep.subr.bf16.mxu0 %v1907_v44 }
0x2a74   :  { %2495 = vmatpush3.bf16.msra.mxu0 %v1907_v44  ;;  %v2030_v44 = vld [vmem:[%s3668_s15 + $0x28] sm:$0xff] }
0x2a75   :  { %2496 = vmatprep.subr.bf16.mxu0 %v1908_v60  ;;  %v2039_v19 = vpack.c.bf16 %v2030_v44, %v2029_v17 }
0x2a78   :  { %2497 = vmatpush3.bf16.msra.mxu0 %v1908_v60  ;;  %v2032_v60 = vld [vmem:[%s3668_s15 + $0x38] sm:$0xff] }
0x2add   :  { %v1650_v63 = vpop.permute.xlu1 %1649 }
0x2ade   :  { %2471 = vmatmul.mubr.msk.bf16.gmra.mrb[48].mxu0 %vm368_vm4, %v1650_v63 }
0x2b3e   :  { %v2468_v32 = vpop.f32.mrb[44].mxu0 }
0x2b3f   :  { %v1706_v33 = vadd.f32 %v2468_v32, %v2188_v31  ;;  %v1697_v34 = vpop.f32.mrb[45].mxu0  ;;  %v2193_v32 = vld [vmem:[#allocation14] ss:$0 sm:$0xff] }
0x2b40   :  { %v1698_v35 = vadd.f32 %v2188_v31, %v1697_v34  ;;  %v2469_v36 = vpop.f32.mrb[46].mxu0 }
0x2b41   :  { %v1730_v55 = vand.u32 2147483647, %v1706_v33  ;;  %v1709_v20 = vadd.f32 %v2469_v36, %v2188_v31  ;;  %v1700_v42 = vpop.f32.mrb[47].mxu0 }
0x2b42   :  { %v1728_v38 = vand.u32 2147483647, %v1698_v35  ;;  %v1701_v39 = vadd.f32 %v2188_v31, %v1700_v42 }
0x2b43   :  { %v1738_v37 = vadd.f32 1.0, %v1730_v55  ;;  %v1731_v6 = vand.u32 2147483647, %v1709_v20 }
0x2b44   :  { %v1736_v40 = vadd.f32 1.0, %v1728_v38  ;;  %v1729_v43 = vand.u32 2147483647, %v1701_v39 }
0x2b45   :  { %2667 = vrcp.f32 %v1738_v37  ;;  %v1739_v0 = vadd.f32 1.0, %v1731_v6 }
0x2b46   :  { %2669 = vrcp.f32 %v1736_v40  ;;  %v1737_v27 = vadd.f32 1.0, %v1729_v43 }
0x2b47   :  { %2671 = vrcp.f32 %v1739_v0 }
0x2b48   :  { %2673 = vrcp.f32 %v1737_v27 }
0x2b4f   :  { %v2668_v1 = vpop.eup %2667 }
0x2b50   :  { %v2670_v45 = vpop.eup %2669  ;;  %v1754_v26 = vmul.f32 %v2668_v1, %v1706_v33 }
0x2b51   :  { %v2672_v46 = vpop.eup %2671  ;;  %v1752_v53 = vmul.f32 %v2670_v45, %v1698_v35 }
0x2b52   :  { %v2674_v48 = vpop.eup %2673  ;;  %v1755_v49 = vmul.f32 %v2672_v46, %v1709_v20 }
0x2b53   :  { %v1753_v56 = vmul.f32 %v2674_v48, %v1701_v39 }
0x2b54   :  { %v1769_v15 = vpack.c.bf16 %v1755_v49, %v1754_v26 }
0x2b55   :  { %v1768_v54 = vpack.c.bf16 %v1753_v56, %v1752_v53 }
0x2b57   :  { %2482 = vmatprep.mubr.msk.bf16.mxu1 %vm1783_vm5, %v1768_v54 }
0x2b58   :  { %2483 = vmatmul.mubr.msk.bf16.vlgmr.msra.gmra.mrb[44].mxu1 %vm1783_vm5, %v1769_v15 }
0x2bb1   :  { %v2472_v57 = vpop.f32.mrb[48].mxu0 }
0x2bb2   :  { %v1722_v3 = vadd.f32 %v2472_v57, %v2188_v31  ;;  %v1713_v25 = vpop.f32.mrb[49].mxu0 }
0x2bb3   :  { %v1714_v50 = vadd.f32 %v2188_v31, %v1713_v25  ;;  %v2473_v59 = vpop.f32.mrb[50].mxu0 }
0x2bb4   :  { %v1734_v4 = vand.u32 2147483647, %v1722_v3  ;;  %v1725_v7 = vadd.f32 %v2473_v59, %v2188_v31  ;;  %v1716_v8 = vpop.f32.mrb[51].mxu0 }
0x2bb5   :  { %v1732_v9 = vand.u32 2147483647, %v1714_v50  ;;  %v1717_v10 = vadd.f32 %v2188_v31, %v1716_v8 }
0x2bb6   :  { %v1742_v11 = vadd.f32 1.0, %v1734_v4  ;;  %v1735_v51 = vand.u32 2147483647, %v1725_v7 }
0x2bb7   :  { %v1740_v52 = vadd.f32 1.0, %v1732_v9  ;;  %v1733_v5 = vand.u32 2147483647, %v1717_v10 }
0x2bb8   :  { %2675 = vrcp.f32 %v1742_v11  ;;  %v1743_v13 = vadd.f32 1.0, %v1735_v51 }
0x2bb9   :  { %2677 = vrcp.f32 %v1740_v52  ;;  %v1741_v14 = vadd.f32 1.0, %v1733_v5  ;;  %v2028_v52 = vld [vmem:[%s3668_s15 + $0x18] sm:$0xff] }
0x2bba   :  { %2679 = vrcp.f32 %v1743_v13  ;;  %v2038_v13 = vpack.c.bf16 %v2028_v52, %v2027_v18 }
0x2bbb   :  { %2681 = vrcp.f32 %v1741_v14 }
0x2bc2   :  { %v2676_v21 = vpop.eup %2675 }
0x2bc3   :  { %v2678_v22 = vpop.eup %2677  ;;  %v1758_v24 = vmul.f32 %v2676_v21, %v1722_v3  ;;  %v2040_v21 = vpack.c.bf16 %v2032_v60, %v2031_v47 }
0x2bc4   :  { %v2680_v58 = vpop.eup %2679  ;;  %v1756_v29 = vmul.f32 %v2678_v22, %v1714_v50  ;;  %v2026_v50 = vld [vmem:[%s3668_s15 + $0x8] sm:$0xff] }
0x2bc5   :  { %v2682_v23 = vpop.eup %2681  ;;  %v1759_v28 = vmul.f32 %v2680_v58, %v1725_v7  ;;  %v2037_v4 = vpack.c.bf16 %v2026_v50, %v2025_v62 }
0x2bc6   :  { %v1757_v30 = vmul.f32 %v2682_v23, %v1717_v10 }
0x2bc7   :  { %v1771_v63 = vpack.c.bf16 %v1759_v28, %v1758_v24  ;;  %2506 = vmatprep.subr.bf16.mxu1 %v2037_v4 }
0x2bc8   :  { %v1770_v31 = vpack.c.bf16 %v1757_v30, %v1756_v29  ;;  %2507 = vmatpush3.bf16.msra.mxu1 %v2037_v4 }
0x2bc9   :  { %2508 = vmatprep.subr.bf16.mxu1 %v2038_v13 }
0x2bca   :  { %2486 = vmatprep.mubr.msk.bf16.mxu1 %vm1783_vm5, %v1770_v31 }
0x2bcb   :  { %2487 = vmatmul.mubr.msk.bf16.gmra.mrb[48].mxu1 %vm1783_vm5, %v1771_v63 }
0x2bcc   :  { %2509 = vmatpush3.bf16.msra.mxu1 %v2038_v13 }
0x2bcd   :  { %2510 = vmatprep.subr.bf16.mxu1 %v2039_v19 }
0x2bd0   :  { %2511 = vmatpush3.bf16.msra.mxu1 %v2039_v19 }
0x2bd1   :  { %2512 = vmatprep.subr.bf16.mxu1 %v2040_v21 }
0x2bd4   :  { %2513 = vmatpush3.bf16.msra.mxu1 %v2040_v21  ;;  %v2203_v21 = vld [vmem:[#allocation2] ss:$0 sm:$0xff] }
0x2c2b   :  { %v2484_v33 = vpop.f32.mrb[44].mxu1 }
0x2c2c   :  { %v1839_v34 = vadd.f32 %v2484_v33, %v2193_v32  ;;  %v1830_v35 = vpop.f32.mrb[45].mxu1  ;;  %v2198_v33 = vld [vmem:[#allocation16] ss:$0 sm:$0xff] }
0x2c2d   :  { %v1831_v36 = vadd.f32 %v2193_v32, %v1830_v35  ;;  %v2485_v55 = vpop.f32.mrb[46].mxu1 }
0x2c2e   :  { %v1863_v20 = vand.u32 2147483647, %v1839_v34  ;;  %v1842_v42 = vadd.f32 %v2485_v55, %v2193_v32  ;;  %v1833_v38 = vpop.f32.mrb[47].mxu1 }
0x2c2f   :  { %v1861_v39 = vand.u32 2147483647, %v1831_v36  ;;  %v1834_v37 = vadd.f32 %v2193_v32, %v1833_v38 }
0x2c30   :  { %v1871_v6 = vadd.f32 1.0, %v1863_v20  ;;  %v1864_v40 = vand.u32 2147483647, %v1842_v42 }
0x2c31   :  { %v1869_v43 = vadd.f32 1.0, %v1861_v39  ;;  %v1862_v0 = vand.u32 2147483647, %v1834_v37 }
0x2c32   :  { %2683 = vrcp.f32 %v1871_v6  ;;  %v1872_v27 = vadd.f32 1.0, %v1864_v40 }
0x2c33   :  { %2685 = vrcp.f32 %v1869_v43  ;;  %v1870_v1 = vadd.f32 1.0, %v1862_v0 }
0x2c34   :  { %2687 = vrcp.f32 %v1872_v27 }
0x2c35   :  { %2689 = vrcp.f32 %v1870_v1 }
0x2c3c   :  { %v2684_v45 = vpop.eup %2683 }
0x2c3d   :  { %v2686_v46 = vpop.eup %2685  ;;  %v1887_v49 = vmul.f32 %v2684_v45, %v1839_v34 }
0x2c3e   :  { %v2688_v48 = vpop.eup %2687  ;;  %v1885_v56 = vmul.f32 %v2686_v46, %v1831_v36 }
0x2c3f   :  { %v2690_v26 = vpop.eup %2689  ;;  %v1888_v53 = vmul.f32 %v2688_v48, %v1842_v42 }
0x2c40   :  { %v1886_v15 = vmul.f32 %v2690_v26, %v1834_v37 }
0x2c41   :  { %v1902_v54 = vpack.c.bf16 %v1888_v53, %v1887_v49 }
0x2c42   :  { %v1901_v57 = vpack.c.bf16 %v1886_v15, %v1885_v56 }
0x2c44   :  { %2498 = vmatprep.mubr.msk.bf16.mxu0 %vm1783_vm5, %v1901_v57 }
0x2c45   :  { %2499 = vmatmul.mubr.msk.bf16.vlgmr.msra.gmra.mrb[52].mxu0 %vm1783_vm5, %v1902_v54 }
0x2c9e   :  { %v2488_v3 = vpop.f32.mrb[48].mxu1 }
0x2c9f   :  { %v1855_v25 = vadd.f32 %v2488_v3, %v2193_v32  ;;  %v1846_v61 = vpop.f32.mrb[49].mxu1 }
0x2ca0   :  { %v1847_v59 = vadd.f32 %v2193_v32, %v1846_v61  ;;  %v2489_v2 = vpop.f32.mrb[50].mxu1 }
0x2ca1   :  { %v1867_v7 = vand.u32 2147483647, %v1855_v25  ;;  %v1858_v8 = vadd.f32 %v2489_v2, %v2193_v32  ;;  %v1849_v9 = vpop.f32.mrb[51].mxu1 }
0x2ca2   :  { %v1865_v10 = vand.u32 2147483647, %v1847_v59  ;;  %v1850_v11 = vadd.f32 %v2193_v32, %v1849_v9 }
0x2ca3   :  { %v1875_v51 = vadd.f32 1.0, %v1867_v7  ;;  %v1868_v12 = vand.u32 2147483647, %v1858_v8 }
0x2ca4   :  { %v1873_v5 = vadd.f32 1.0, %v1865_v10  ;;  %v1866_v41 = vand.u32 2147483647, %v1850_v11 }
0x2ca5   :  { %2691 = vrcp.f32 %v1875_v51  ;;  %v1876_v14 = vadd.f32 1.0, %v1868_v12 }
0x2ca6   :  { %2693 = vrcp.f32 %v1873_v5  ;;  %v1874_v16 = vadd.f32 1.0, %v1866_v41 }
0x2ca7   :  { %2695 = vrcp.f32 %v1876_v14 }
0x2ca8   :  { %2697 = vrcp.f32 %v1874_v16 }
0x2caf   :  { %v2692_v22 = vpop.eup %2691 }
0x2cb0   :  { %v2694_v58 = vpop.eup %2693  ;;  %v1891_v28 = vmul.f32 %v2692_v22, %v1855_v25 }
0x2cb1   :  { %v2696_v23 = vpop.eup %2695  ;;  %v1889_v30 = vmul.f32 %v2694_v58, %v1847_v59 }
0x2cb2   :  { %v2698_v24 = vpop.eup %2697  ;;  %v1892_v29 = vmul.f32 %v2696_v23, %v1858_v8 }
0x2cb3   :  { %v1890_v63 = vmul.f32 %v2698_v24, %v1850_v11 }
0x2cb4   :  { %v1904_v31 = vpack.c.bf16 %v1892_v29, %v1891_v28 }
0x2cb5   :  { %v1903_v32 = vpack.c.bf16 %v1890_v63, %v1889_v30 }
0x2cb7   :  { %2502 = vmatprep.mubr.msk.bf16.mxu0 %vm1783_vm5, %v1903_v32 }
0x2cb8   :  { %2503 = vmatmul.mubr.msk.bf16.gmra.mrb[56].mxu0 %vm1783_vm5, %v1904_v31 }
0x2d18   :  { %v2500_v34 = vpop.f32.mrb[52].mxu0 }
0x2d19   :  { %v1971_v35 = vadd.f32 %v2500_v34, %v2198_v33  ;;  %v1962_v36 = vpop.f32.mrb[53].mxu0 }
0x2d1a   :  { %v1963_v55 = vadd.f32 %v2198_v33, %v1962_v36  ;;  %v2501_v20 = vpop.f32.mrb[54].mxu0 }
0x2d1b   :  { %v1995_v42 = vand.u32 2147483647, %v1971_v35  ;;  %v1974_v38 = vadd.f32 %v2501_v20, %v2198_v33  ;;  %v1965_v39 = vpop.f32.mrb[55].mxu0 }
0x2d1c   :  { %v1993_v37 = vand.u32 2147483647, %v1963_v55  ;;  %v1966_v6 = vadd.f32 %v2198_v33, %v1965_v39 }
0x2d1d   :  { %v2003_v40 = vadd.f32 1.0, %v1995_v42  ;;  %v1996_v43 = vand.u32 2147483647, %v1974_v38 }
0x2d1e   :  { %v2001_v0 = vadd.f32 1.0, %v1993_v37  ;;  %v1994_v27 = vand.u32 2147483647, %v1966_v6 }
0x2d1f   :  { %2699 = vrcp.f32 %v2003_v40  ;;  %v2004_v1 = vadd.f32 1.0, %v1996_v43 }
0x2d20   :  { %2701 = vrcp.f32 %v2001_v0  ;;  %v2002_v45 = vadd.f32 1.0, %v1994_v27 }
0x2d21   :  { %2703 = vrcp.f32 %v2004_v1 }
0x2d22   :  { %2705 = vrcp.f32 %v2002_v45 }
0x2d29   :  { %v2700_v46 = vpop.eup %2699 }
0x2d2a   :  { %v2702_v48 = vpop.eup %2701  ;;  %v2019_v53 = vmul.f32 %v2700_v46, %v1971_v35 }
0x2d2b   :  { %v2704_v26 = vpop.eup %2703  ;;  %v2017_v15 = vmul.f32 %v2702_v48, %v1963_v55 }
0x2d2c   :  { %v2706_v49 = vpop.eup %2705  ;;  %v2020_v56 = vmul.f32 %v2704_v26, %v1974_v38 }
0x2d2d   :  { %v2018_v54 = vmul.f32 %v2706_v49, %v1966_v6 }
0x2d2e   :  { %v2034_v57 = vpack.c.bf16 %v2020_v56, %v2019_v53 }
0x2d2f   :  { %v2033_v3 = vpack.c.bf16 %v2018_v54, %v2017_v15 }
0x2d31   :  { %2514 = vmatprep.mubr.msk.bf16.mxu1 %vm1783_vm5, %v2033_v3 }
0x2d32   :  { %2515 = vmatmul.mubr.msk.bf16.vlgmr.msra.gmra.mrb[52].mxu1 %vm1783_vm5, %v2034_v57 }
0x2d8b   :  { %v2504_v25 = vpop.f32.mrb[56].mxu0 }
0x2d8c   :  { %v1987_v61 = vadd.f32 %v2504_v25, %v2198_v33  ;;  %v1978_v62 = vpop.f32.mrb[57].mxu0 }
0x2d8d   :  { %v1979_v50 = vadd.f32 %v2198_v33, %v1978_v62  ;;  %v2505_v59 = vpop.f32.mrb[58].mxu0 }
0x2d8e   :  { %v1999_v2 = vand.u32 2147483647, %v1987_v61  ;;  %v1990_v4 = vadd.f32 %v2505_v59, %v2198_v33  ;;  %v1981_v7 = vpop.f32.mrb[59].mxu0 }
0x2d8f   :  { %v1997_v8 = vand.u32 2147483647, %v1979_v50  ;;  %v1982_v9 = vadd.f32 %v2198_v33, %v1981_v7 }
0x2d90   :  { %v2007_v10 = vadd.f32 1.0, %v1999_v2  ;;  %v2000_v11 = vand.u32 2147483647, %v1990_v4 }
0x2d91   :  { %v2005_v51 = vadd.f32 1.0, %v1997_v8  ;;  %v1998_v12 = vand.u32 2147483647, %v1982_v9 }
0x2d92   :  { %2707 = vrcp.f32 %v2007_v10  ;;  %v2008_v18 = vadd.f32 1.0, %v2000_v11 }
0x2d93   :  { %2709 = vrcp.f32 %v2005_v51  ;;  %v2006_v52 = vadd.f32 1.0, %v1998_v12 }
0x2d94   :  { %2711 = vrcp.f32 %v2008_v18 }
0x2d95   :  { %2713 = vrcp.f32 %v2006_v52 }
0x2d9c   :  { %v2708_v5 = vpop.eup %2707 }
0x2d9d   :  { %v2710_v41 = vpop.eup %2709  ;;  %v2023_v16 = vmul.f32 %v2708_v5, %v1987_v61 }
0x2d9e   :  { %v2712_v13 = vpop.eup %2711  ;;  %v2021_v44 = vmul.f32 %v2710_v41, %v1979_v50 }
0x2d9f   :  { %v2714_v14 = vpop.eup %2713  ;;  %v2024_v17 = vmul.f32 %v2712_v13, %v1990_v4 }
0x2da0   :  { %v2022_v19 = vmul.f32 %v2714_v14, %v1982_v9 }
0x2da1   :  { %v2036_v47 = vpack.c.bf16 %v2024_v17, %v2023_v16 }
0x2da2   :  { %v2035_v60 = vpack.c.bf16 %v2022_v19, %v2021_v44 }
0x2da4   :  { %2518 = vmatprep.mubr.msk.bf16.mxu1 %vm1783_vm5, %v2035_v60 }
0x2da5   :  { %2519 = vmatmul.mubr.msk.bf16.gmra.mrb[56].mxu1 %vm1783_vm5, %v2036_v47 }
0x2e05   :  { %v2516_v22 = vpop.f32.mrb[52].mxu1 }
0x2e06   :  { %v2103_v58 = vadd.f32 %v2516_v22, %v2203_v21  ;;  %v2094_v23 = vpop.f32.mrb[53].mxu1 }
0x2e07   :  { %v2095_v24 = vadd.f32 %v2203_v21, %v2094_v23  ;;  %v2517_v28 = vpop.f32.mrb[54].mxu1 }
0x2e08   :  { %2128 = vst.msk [vmem:[%s3670_s17 + $0x10] sm:$0xff] %vm2125_vm6, %v2103_v58  ;;  %v2106_v29 = vadd.f32 %v2517_v28, %v2203_v21  ;;  %v2097_v30 = vpop.f32.mrb[55].mxu1 }
0x2e09   :  { %2126 = vst.msk [vmem:[%s3670_s17] sm:$0xff] %vm2125_vm6, %v2095_v24  ;;  %v2098_v63 = vadd.f32 %v2203_v21, %v2097_v30 }
0x2e0a   :  { %2129 = vst.msk [vmem:[%s3670_s17 + $0x18] sm:$0xff] %vm2125_vm6, %v2106_v29 }
0x2e0b   :  { %2127 = vst.msk [vmem:[%s3670_s17 + $0x8] sm:$0xff] %vm2125_vm6, %v2098_v63 }
0x2e78   :  { %v2520_v31 = vpop.f32.mrb[56].mxu1 }
0x2e79   :  { %v2119_v32 = vadd.f32 %v2520_v31, %v2203_v21  ;;  %v2110_v33 = vpop.f32.mrb[57].mxu1 }
0x2e7a   :  { %v2111_v34 = vadd.f32 %v2203_v21, %v2110_v33  ;;  %v2521_v35 = vpop.f32.mrb[58].mxu1 }
0x2e7b   :  { %2132 = vst.msk [vmem:[%s3670_s17 + $0x30] sm:$0xff] %vm2125_vm6, %v2119_v32  ;;  %v2122_v36 = vadd.f32 %v2521_v35, %v2203_v21  ;;  %v2113_v55 = vpop.f32.mrb[59].mxu1 }
0x2e7c   :  { %2130 = vst.msk [vmem:[%s3670_s17 + $0x20] sm:$0xff] %vm2125_vm6, %v2111_v34  ;;  %v2114_v20 = vadd.f32 %v2203_v21, %v2113_v55 }
0x2e7d   :  { %2133 = vst.msk [vmem:[%s3670_s17 + $0x38] sm:$0xff] %vm2125_vm6, %v2122_v36 }
0x2e7e   :  { %2131 = vst.msk [vmem:[%s3670_s17 + $0x28] sm:$0xff] %vm2125_vm6, %v2114_v20 }
0x2e7f   :  { %2138 = vsyncpa [#allocation4], 1 }
0x2e80   :  { %2139 = vsyncpa [#allocation6], 1 }
0x2e81   :  { %2140 = vsyncpa [#allocation9], 1 }
0x2e82   :  { %2141 = vsyncpa [#allocation12], 1 }
0x2e83   :  { %2142 = vsyncpa [#allocation15], 1 }

</bundles_post_ra>
